<compile_context>
chip_gen: v7x
topology: tpu7x:2x2x1
jax: 0.10.0
libtpu: 0.0.40
codegen_flags: <defaults>
</compile_context>

<pallas_src>
import functools

import jax
import jax.numpy as jnp
from jax import lax
from jax.experimental import pallas as pl
from jax.experimental.pallas import tpu as pltpu


# ---------------------------------------------------------------------------
# Pallas kernel: one grid step == Tb LSTM time steps (recurrent part only).
# ---------------------------------------------------------------------------
def _gconvlstm_kernel(p_ref, a_ref, wh_ref, h_ref, c_ref, *, Tb, H, T, Tpad):
    tb = pl.program_id(0)

    @pl.when(tb == 0)
    def _():
        h_ref[...] = jnp.zeros_like(h_ref)
        c_ref[...] = jnp.zeros_like(c_ref)

    a_bf = a_ref[...]        # (N, N)   bf16, VMEM-resident
    wh_bf = wh_ref[...]      # (H, 4H)  bf16, VMEM-resident

    def step(s, carry):
        def body():
            h = h_ref[...]                                        # (N, H) f32 state
            c = c_ref[...]                                        # (N, H) f32 state
            # Recurrent GCN term, reassociated: (A @ h) @ Wh.
            ah = jnp.dot(a_bf, h.astype(jnp.bfloat16),
                         preferred_element_type=jnp.float32)      # (N, H)
            rec = jnp.dot(ah.astype(jnp.bfloat16), wh_bf,
                          preferred_element_type=jnp.float32)     # (N, 4H)
            conv = rec + p_ref[s]          # + hoisted A @ (x_t @ Wx) + bias
            i_g = jax.nn.sigmoid(conv[:, 0 * H:1 * H])
            f_g = jax.nn.sigmoid(conv[:, 1 * H:2 * H])
            o_g = jax.nn.sigmoid(conv[:, 2 * H:3 * H])
            g_g = jnp.tanh(conv[:, 3 * H:4 * H])
            c_next = f_g * c + i_g * g_g
            h_next = o_g * jnp.tanh(c_next)
            h_ref[...] = h_next.astype(h_ref.dtype)
            c_ref[...] = c_next.astype(c_ref.dtype)

        if Tpad == T:                         # trace-time: no padding -> no mask
            body()
        else:
            pl.when(tb * Tb + s < T)(body)    # skip padded tail steps
        return carry

    lax.fori_loop(0, Tb, step, None, unroll=True)


# ---------------------------------------------------------------------------
# Wrapper: hoisted input-path GEMM (XLA) + pallas_call for the recurrence.
# ---------------------------------------------------------------------------
@functools.partial(jax.jit, static_argnames=("hidden_channel",))
def gconvlstm_encoder(x_seq, a_norm, weight_t, bias, hidden_channel):
    """x_seq: (T, N, C) f32; a_norm: (N, N); weight_t: (C+H, 4H); bias: (4H,)."""
    T, N, Cin = x_seq.shape
    H = hidden_channel
    wx = weight_t[:Cin, :]                    # (C, 4H)
    wh = weight_t[Cin:, :]                    # (H, 4H)

    # ---- hoisted, time-parallel input path: P[t] = A @ (x[t] @ Wx) + bias ----
    xw = jnp.einsum('tnc,ch->tnh', x_seq, wx)                         # (T, N, 4H)
    p_all = (jnp.einsum('nm,tmh->tnh', a_norm, xw)
             + bias[None, None, :]).astype(jnp.float32)               # (T, N, 4H)

    # ---- block the time axis ----
    Tb = max(1, min(T, 8))
    Tpad = pl.cdiv(T, Tb) * Tb
    if Tpad != T:
        p_all = jnp.pad(p_all, ((0, Tpad - T), (0, 0), (0, 0)))

    # ---- bf16 MXU operands (accumulation stays f32 inside the kernel) ----
    a_bf = a_norm.astype(jnp.bfloat16)
    wh_bf = wh.astype(jnp.bfloat16)

    kernel = functools.partial(_gconvlstm_kernel, Tb=Tb, H=H, T=T, Tpad=Tpad)

    grid_spec = pltpu.PrefetchScalarGridSpec(
        num_scalar_prefetch=0,
        grid=(Tpad // Tb,),
        in_specs=[
            pl.BlockSpec((Tb, N, 4 * H), lambda tb: (tb, 0, 0)),   # P slab per step
            pl.BlockSpec((N, N), lambda tb: (0, 0)),               # A_norm (resident)
            pl.BlockSpec((H, 4 * H), lambda tb: (0, 0)),           # Wh (resident)
        ],
        out_specs=[
            pl.BlockSpec((N, H), lambda tb: (0, 0)),   # h_T (doubles as state carry)
            pl.BlockSpec((N, H), lambda tb: (0, 0)),   # c_T (doubles as state carry)
        ],
    )

    # VMEM working-set estimate (double-buffered P slab + resident A/Wh + h/c).
    # Matters on v7x (64 MiB part, 32 MiB default scoped limit); only raise the
    # scoped limit when the working set is actually large.
    vmem_est = (2 * Tb * N * 4 * H * 4          # P slabs (f32, double-buffered)
                + 2 * N * N * 2                 # A_norm (bf16)
                + 2 * H * 4 * H * 2             # Wh (bf16)
                + 2 * N * H * 4)                # h/c outputs (f32)
    cp_kwargs = dict(dimension_semantics=("arbitrary",))   # serial recurrence
    if vmem_est > 16 * 1024 * 1024:
        cp_kwargs["vmem_limit_bytes"] = int(min(2 * vmem_est, 60 * 1024 * 1024))

    return pl.pallas_call(
        kernel,
        out_shape=(jax.ShapeDtypeStruct((N, H), x_seq.dtype),
                   jax.ShapeDtypeStruct((N, H), x_seq.dtype)),
        grid_spec=grid_spec,
        compiler_params=pltpu.CompilerParams(**cp_kwargs),
    )(p_all, a_bf, wh_bf)


# ---------------------------------------------------------------------------
# Glue: PyG-style GCN normalisation (dense) and a pure-JAX reference.
# ---------------------------------------------------------------------------
def gcn_norm_dense(edge_index, edge_weight, num_nodes):
    """Dense D^-1/2 (A + I) D^-1/2 matching torch_geometric.nn.GCNConv defaults.
    Aggregation is out[col] += norm * x[row], i.e. A[col, row] = norm."""
    row, col = edge_index[0], edge_index[1]
    loop = jnp.arange(num_nodes, dtype=row.dtype)
    row = jnp.concatenate([row, loop])
    col = jnp.concatenate([col, loop])
    w = jnp.concatenate([edge_weight,
                         jnp.ones((num_nodes,), dtype=edge_weight.dtype)])
    deg = jnp.zeros((num_nodes,), dtype=w.dtype).at[col].add(w)
    dinv = jnp.where(deg > 0, 1.0 / jnp.sqrt(deg), 0.0)
    norm = dinv[row] * w * dinv[col]
    a = jnp.zeros((num_nodes, num_nodes), dtype=w.dtype).at[col, row].add(norm)
    return a


def ref_forward(x_seq, a_norm, weight_t, bias, H):
    """Pure-JAX f32 reference of GConvLSTM_encoder.forward (init_states=None)."""
    T, N, _ = x_seq.shape
    h = jnp.zeros((N, H), x_seq.dtype)
    c = jnp.zeros((N, H), x_seq.dtype)
    for t in range(T):
        comb = jnp.concatenate([x_seq[t], h], axis=1)
        conv = a_norm @ (comb @ weight_t) + bias
        cc_i, cc_f, cc_o, cc_g = jnp.split(conv, 4, axis=1)
        i = jax.nn.sigmoid(cc_i)
        f = jax.nn.sigmoid(cc_f)
        o = jax.nn.sigmoid(cc_o)
        g = jnp.tanh(cc_g)
        c = f * c + i * g
        h = o * jnp.tanh(c)
    return h, c


if __name__ == "__main__":
    # Small, module-consistent shapes: seq=8, nodes=16, input_channel=4, hidden=32.
    T, N, C_IN, HID = 8, 16, 4, 32
    E = 40

    key = jax.random.PRNGKey(0)
    k_x, k_src, k_dst, k_w, k_lin = jax.random.split(key, 5)

    x_seq = jax.random.normal(k_x, (T, N, C_IN), dtype=jnp.float32)
    edge_index = jnp.stack([
        jax.random.randint(k_src, (E,), 0, N, dtype=jnp.int32),
        jax.random.randint(k_dst, (E,), 0, N, dtype=jnp.int32),
    ])
    edge_attr = jax.random.uniform(k_w, (E,), jnp.float32, 0.5, 1.5)

    # GCNConv.lin.weight: (4H, C+H), xavier_normal_; applied as x @ weight.T.
    fan_in, fan_out = C_IN + HID, 4 * HID
    std = (2.0 / (fan_in + fan_out)) ** 0.5
    lin_weight = std * jax.random.normal(k_lin, (4 * HID, C_IN + HID), jnp.float32)
    weight_t = lin_weight.T                       # (C+H, 4H)
    bias = jnp.zeros((4 * HID,), jnp.float32)     # GCNConv bias init is zeros

    a_norm = gcn_norm_dense(edge_index, edge_attr, N)

    h_out, c_out = gconvlstm_encoder(x_seq, a_norm, weight_t, bias, HID)
    jax.block_until_ready((h_out, c_out))

    h_ref, c_ref = ref_forward(x_seq, a_norm, weight_t, bias, HID)

    # bf16 MXU operands (f32 accumulation) inside the recurrence -> compare against
    # the pure-f32 reference with a correspondingly loosened tolerance.
    assert jnp.allclose(h_out, h_ref, atol=5e-2, rtol=5e-2), \
        float(jnp.max(jnp.abs(h_out - h_ref)))
    assert jnp.allclose(c_out, c_ref, atol=5e-2, rtol=5e-2), \
        float(jnp.max(jnp.abs(c_out - c_ref)))

    print("KERNEL_OK")
</pallas_src>

<mosaic_0001>
module attributes {stable_mosaic.version = 11 : i64} {
  func.func @_gconvlstm_kernel(%arg0: i32, %arg1: memref<8x16x128xf32, #tpu.memory_space<vmem>>, %arg2: memref<16x16xbf16, #tpu.memory_space<vmem>>, %arg3: memref<32x128xbf16, #tpu.memory_space<vmem>>, %arg4: memref<16x32xf32, #tpu.memory_space<vmem>>, %arg5: memref<16x32xf32, #tpu.memory_space<vmem>>) attributes {dimension_semantics = [#tpu.dimension_semantics<arbitrary>], iteration_bounds = array<i64: 1>, scalar_prefetch = 0 : i64, scratch_operands = 0 : i64, tpu.core_type = #tpu.core_type<tc>, window_params = [{transform_indices = @transform_0, window_bounds = array<i64: 8, 16, 128>}, {pipeline_mode = #tpu.pipeline_mode<synchronous>, transform_indices = @transform_1, window_bounds = array<i64: 16, 16>}, {pipeline_mode = #tpu.pipeline_mode<synchronous>, transform_indices = @transform_2, window_bounds = array<i64: 32, 128>}, {pipeline_mode = #tpu.pipeline_mode<synchronous>, transform_indices = @transform_3, window_bounds = array<i64: 16, 32>}, {pipeline_mode = #tpu.pipeline_mode<synchronous>, transform_indices = @transform_4, window_bounds = array<i64: 16, 32>}]} {
    %c0_i32 = arith.constant 0 : i32
    %0 = arith.cmpi eq, %arg0, %c0_i32 : i32
    %1 = arith.extui %0 : i1 to i32
    %c0_i32_0 = arith.constant 0 : i32
    %2 = arith.cmpi ne, %1, %c0_i32_0 : i32
    scf.if %2 {
      %cst_124 = arith.constant 0.000000e+00 : f32
      %301 = vector.broadcast %cst_124 : f32 to vector<16x32xf32>
      %c0_125 = arith.constant 0 : index
      %c0_126 = arith.constant 0 : index
      %302 = vector.load %arg4[%c0_125, %c0_126] : memref<16x32xf32, #tpu.memory_space<vmem>>, vector<16x32xf32>
      tpu.vector_store %arg4[%c0_125, %c0_126], %301 {strides = array<i32>} : memref<16x32xf32, #tpu.memory_space<vmem>>, vector<16x32xf32>,
      %cst_127 = arith.constant 0.000000e+00 : f32
      %303 = vector.broadcast %cst_127 : f32 to vector<16x32xf32>
      %c0_128 = arith.constant 0 : index
      %c0_129 = arith.constant 0 : index
      %304 = vector.load %arg5[%c0_128, %c0_129] : memref<16x32xf32, #tpu.memory_space<vmem>>, vector<16x32xf32>
      tpu.vector_store %arg5[%c0_128, %c0_129], %303 {strides = array<i32>} : memref<16x32xf32, #tpu.memory_space<vmem>>, vector<16x32xf32>,
    } else {
    }
    %c0 = arith.constant 0 : index
    %c0_1 = arith.constant 0 : index
    %3 = vector.load %arg2[%c0, %c0_1] : memref<16x16xbf16, #tpu.memory_space<vmem>>, vector<16x16xbf16>
    %c0_2 = arith.constant 0 : index
    %c0_3 = arith.constant 0 : index
    %4 = vector.load %arg3[%c0_2, %c0_3] : memref<32x128xbf16, #tpu.memory_space<vmem>>, vector<32x128xbf16>
    %c0_i32_4 = arith.constant 0 : i32
    %c0_5 = arith.constant 0 : index
    %c0_6 = arith.constant 0 : index
    %5 = vector.load %arg4[%c0_5, %c0_6] : memref<16x32xf32, #tpu.memory_space<vmem>>, vector<16x32xf32>
    %c0_7 = arith.constant 0 : index
    %c0_8 = arith.constant 0 : index
    %6 = vector.load %arg5[%c0_7, %c0_8] : memref<16x32xf32, #tpu.memory_space<vmem>>, vector<16x32xf32>
    %7 = arith.truncf %5 : vector<16x32xf32> to vector<16x32xbf16>
    %cst = arith.constant dense<0.000000e+00> : vector<16x32xf32>
    %8 = tpu.matmul %3, %7, %cst {dimension_numbers = #tpu.dot_dimension_numbers<[1], [0], [0], [1], [0, 0, 1, 1], [], []>} : vector<16x16xbf16>, vector<16x32xbf16>, vector<16x32xf32> -> vector<16x32xf32>
    %9 = arith.truncf %8 : vector<16x32xf32> to vector<16x32xbf16>
    %cst_9 = arith.constant dense<0.000000e+00> : vector<16x128xf32>
    %10 = tpu.matmul %9, %4, %cst_9 {dimension_numbers = #tpu.dot_dimension_numbers<[1], [0], [0], [1], [0, 0, 1, 1], [], []>} : vector<16x32xbf16>, vector<32x128xbf16>, vector<16x128xf32> -> vector<16x128xf32>
    %11 = arith.index_cast %c0_i32_4 : i32 to index
    %c0_10 = arith.constant 0 : index
    %c0_11 = arith.constant 0 : index
    %12 = vector.load %arg1[%11, %c0_10, %c0_11] : memref<8x16x128xf32, #tpu.memory_space<vmem>>, vector<1x16x128xf32>
    %13 = vector.shape_cast %12 : vector<1x16x128xf32> to vector<16x128xf32>
    %14 = arith.addf %10, %13 : vector<16x128xf32>
    %15 = vector.extract_strided_slice %14 {offsets = [0, 0], sizes = [16, 32], strides = [1, 1]} : vector<16x128xf32> to vector<16x32xf32>
    %16 = arith.negf %15 : vector<16x32xf32>
    %17 = math.exp %16 : vector<16x32xf32>
    %cst_12 = arith.constant 1.000000e+00 : f32
    %18 = vector.broadcast %cst_12 : f32 to vector<16x32xf32>
    %19 = arith.addf %18, %17 : vector<16x32xf32>
    %20 = arith.divf %18, %19 : vector<16x32xf32>
    %21 = vector.extract_strided_slice %14 {offsets = [0, 32], sizes = [16, 32], strides = [1, 1]} : vector<16x128xf32> to vector<16x32xf32>
    %22 = arith.negf %21 : vector<16x32xf32>
    %23 = math.exp %22 : vector<16x32xf32>
    %cst_13 = arith.constant 1.000000e+00 : f32
    %24 = vector.broadcast %cst_13 : f32 to vector<16x32xf32>
    %25 = arith.addf %24, %23 : vector<16x32xf32>
    %26 = arith.divf %24, %25 : vector<16x32xf32>
    %27 = vector.extract_strided_slice %14 {offsets = [0, 64], sizes = [16, 32], strides = [1, 1]} : vector<16x128xf32> to vector<16x32xf32>
    %28 = arith.negf %27 : vector<16x32xf32>
    %29 = math.exp %28 : vector<16x32xf32>
    %cst_14 = arith.constant 1.000000e+00 : f32
    %30 = vector.broadcast %cst_14 : f32 to vector<16x32xf32>
    %31 = arith.addf %30, %29 : vector<16x32xf32>
    %32 = arith.divf %30, %31 : vector<16x32xf32>
    %33 = vector.extract_strided_slice %14 {offsets = [0, 96], sizes = [16, 32], strides = [1, 1]} : vector<16x128xf32> to vector<16x32xf32>
    %34 = math.tanh %33 : vector<16x32xf32>
    %35 = arith.mulf %26, %6 : vector<16x32xf32>
    %36 = arith.mulf %20, %34 : vector<16x32xf32>
    %37 = arith.addf %35, %36 : vector<16x32xf32>
    %38 = math.tanh %37 : vector<16x32xf32>
    %39 = arith.mulf %32, %38 : vector<16x32xf32>
    %c0_15 = arith.constant 0 : index
    %c0_16 = arith.constant 0 : index
    %40 = vector.load %arg4[%c0_15, %c0_16] : memref<16x32xf32, #tpu.memory_space<vmem>>, vector<16x32xf32>
    tpu.vector_store %arg4[%c0_15, %c0_16], %39 {strides = array<i32>} : memref<16x32xf32, #tpu.memory_space<vmem>>, vector<16x32xf32>,
    %c0_17 = arith.constant 0 : index
    %c0_18 = arith.constant 0 : index
    %41 = vector.load %arg5[%c0_17, %c0_18] : memref<16x32xf32, #tpu.memory_space<vmem>>, vector<16x32xf32>
    tpu.vector_store %arg5[%c0_17, %c0_18], %37 {strides = array<i32>} : memref<16x32xf32, #tpu.memory_space<vmem>>, vector<16x32xf32>,
    %c1_i32 = arith.constant 1 : i32
    %c0_19 = arith.constant 0 : index
    %c0_20 = arith.constant 0 : index
    %42 = vector.load %arg4[%c0_19, %c0_20] : memref<16x32xf32, #tpu.memory_space<vmem>>, vector<16x32xf32>
    %c0_21 = arith.constant 0 : index
    %c0_22 = arith.constant 0 : index
    %43 = vector.load %arg5[%c0_21, %c0_22] : memref<16x32xf32, #tpu.memory_space<vmem>>, vector<16x32xf32>
    %44 = arith.truncf %42 : vector<16x32xf32> to vector<16x32xbf16>
    %cst_23 = arith.constant dense<0.000000e+00> : vector<16x32xf32>
    %45 = tpu.matmul %3, %44, %cst_23 {dimension_numbers = #tpu.dot_dimension_numbers<[1], [0], [0], [1], [0, 0, 1, 1], [], []>} : vector<16x16xbf16>, vector<16x32xbf16>, vector<16x32xf32> -> vector<16x32xf32>
    %46 = arith.truncf %45 : vector<16x32xf32> to vector<16x32xbf16>
    %cst_24 = arith.constant dense<0.000000e+00> : vector<16x128xf32>
    %47 = tpu.matmul %46, %4, %cst_24 {dimension_numbers = #tpu.dot_dimension_numbers<[1], [0], [0], [1], [0, 0, 1, 1], [], []>} : vector<16x32xbf16>, vector<32x128xbf16>, vector<16x128xf32> -> vector<16x128xf32>
    %48 = arith.index_cast %c1_i32 : i32 to index
    %c0_25 = arith.constant 0 : index
    %c0_26 = arith.constant 0 : index
    %49 = vector.load %arg1[%48, %c0_25, %c0_26] : memref<8x16x128xf32, #tpu.memory_space<vmem>>, vector<1x16x128xf32>
    %50 = vector.shape_cast %49 : vector<1x16x128xf32> to vector<16x128xf32>
    %51 = arith.addf %47, %50 : vector<16x128xf32>
    %52 = vector.extract_strided_slice %51 {offsets = [0, 0], sizes = [16, 32], strides = [1, 1]} : vector<16x128xf32> to vector<16x32xf32>
    %53 = arith.negf %52 : vector<16x32xf32>
    %54 = math.exp %53 : vector<16x32xf32>
    %cst_27 = arith.constant 1.000000e+00 : f32
    %55 = vector.broadcast %cst_27 : f32 to vector<16x32xf32>
    %56 = arith.addf %55, %54 : vector<16x32xf32>
    %57 = arith.divf %55, %56 : vector<16x32xf32>
    %58 = vector.extract_strided_slice %51 {offsets = [0, 32], sizes = [16, 32], strides = [1, 1]} : vector<16x128xf32> to vector<16x32xf32>
    %59 = arith.negf %58 : vector<16x32xf32>
    %60 = math.exp %59 : vector<16x32xf32>
    %cst_28 = arith.constant 1.000000e+00 : f32
    %61 = vector.broadcast %cst_28 : f32 to vector<16x32xf32>
    %62 = arith.addf %61, %60 : vector<16x32xf32>
    %63 = arith.divf %61, %62 : vector<16x32xf32>
    %64 = vector.extract_strided_slice %51 {offsets = [0, 64], sizes = [16, 32], strides = [1, 1]} : vector<16x128xf32> to vector<16x32xf32>
    %65 = arith.negf %64 : vector<16x32xf32>
    %66 = math.exp %65 : vector<16x32xf32>
    %cst_29 = arith.constant 1.000000e+00 : f32
    %67 = vector.broadcast %cst_29 : f32 to vector<16x32xf32>
    %68 = arith.addf %67, %66 : vector<16x32xf32>
    %69 = arith.divf %67, %68 : vector<16x32xf32>
    %70 = vector.extract_strided_slice %51 {offsets = [0, 96], sizes = [16, 32], strides = [1, 1]} : vector<16x128xf32> to vector<16x32xf32>
    %71 = math.tanh %70 : vector<16x32xf32>
    %72 = arith.mulf %63, %43 : vector<16x32xf32>
    %73 = arith.mulf %57, %71 : vector<16x32xf32>
    %74 = arith.addf %72, %73 : vector<16x32xf32>
    %75 = math.tanh %74 : vector<16x32xf32>
    %76 = arith.mulf %69, %75 : vector<16x32xf32>
    %c0_30 = arith.constant 0 : index
    %c0_31 = arith.constant 0 : index
    %77 = vector.load %arg4[%c0_30, %c0_31] : memref<16x32xf32, #tpu.memory_space<vmem>>, vector<16x32xf32>
    tpu.vector_store %arg4[%c0_30, %c0_31], %76 {strides = array<i32>} : memref<16x32xf32, #tpu.memory_space<vmem>>, vector<16x32xf32>,
    %c0_32 = arith.constant 0 : index
    %c0_33 = arith.constant 0 : index
    %78 = vector.load %arg5[%c0_32, %c0_33] : memref<16x32xf32, #tpu.memory_space<vmem>>, vector<16x32xf32>
    tpu.vector_store %arg5[%c0_32, %c0_33], %74 {strides = array<i32>} : memref<16x32xf32, #tpu.memory_space<vmem>>, vector<16x32xf32>,
    %c2_i32 = arith.constant 2 : i32
    %c0_34 = arith.constant 0 : index
    %c0_35 = arith.constant 0 : index
    %79 = vector.load %arg4[%c0_34, %c0_35] : memref<16x32xf32, #tpu.memory_space<vmem>>, vector<16x32xf32>
    %c0_36 = arith.constant 0 : index
    %c0_37 = arith.constant 0 : index
    %80 = vector.load %arg5[%c0_36, %c0_37] : memref<16x32xf32, #tpu.memory_space<vmem>>, vector<16x32xf32>
    %81 = arith.truncf %79 : vector<16x32xf32> to vector<16x32xbf16>
    %cst_38 = arith.constant dense<0.000000e+00> : vector<16x32xf32>
    %82 = tpu.matmul %3, %81, %cst_38 {dimension_numbers = #tpu.dot_dimension_numbers<[1], [0], [0], [1], [0, 0, 1, 1], [], []>} : vector<16x16xbf16>, vector<16x32xbf16>, vector<16x32xf32> -> vector<16x32xf32>
    %83 = arith.truncf %82 : vector<16x32xf32> to vector<16x32xbf16>
    %cst_39 = arith.constant dense<0.000000e+00> : vector<16x128xf32>
    %84 = tpu.matmul %83, %4, %cst_39 {dimension_numbers = #tpu.dot_dimension_numbers<[1], [0], [0], [1], [0, 0, 1, 1], [], []>} : vector<16x32xbf16>, vector<32x128xbf16>, vector<16x128xf32> -> vector<16x128xf32>
    %85 = arith.index_cast %c2_i32 : i32 to index
    %c0_40 = arith.constant 0 : index
    %c0_41 = arith.constant 0 : index
    %86 = vector.load %arg1[%85, %c0_40, %c0_41] : memref<8x16x128xf32, #tpu.memory_space<vmem>>, vector<1x16x128xf32>
    %87 = vector.shape_cast %86 : vector<1x16x128xf32> to vector<16x128xf32>
    %88 = arith.addf %84, %87 : vector<16x128xf32>
    %89 = vector.extract_strided_slice %88 {offsets = [0, 0], sizes = [16, 32], strides = [1, 1]} : vector<16x128xf32> to vector<16x32xf32>
    %90 = arith.negf %89 : vector<16x32xf32>
    %91 = math.exp %90 : vector<16x32xf32>
    %cst_42 = arith.constant 1.000000e+00 : f32
    %92 = vector.broadcast %cst_42 : f32 to vector<16x32xf32>
    %93 = arith.addf %92, %91 : vector<16x32xf32>
    %94 = arith.divf %92, %93 : vector<16x32xf32>
    %95 = vector.extract_strided_slice %88 {offsets = [0, 32], sizes = [16, 32], strides = [1, 1]} : vector<16x128xf32> to vector<16x32xf32>
    %96 = arith.negf %95 : vector<16x32xf32>
    %97 = math.exp %96 : vector<16x32xf32>
    %cst_43 = arith.constant 1.000000e+00 : f32
    %98 = vector.broadcast %cst_43 : f32 to vector<16x32xf32>
    %99 = arith.addf %98, %97 : vector<16x32xf32>
    %100 = arith.divf %98, %99 : vector<16x32xf32>
    %101 = vector.extract_strided_slice %88 {offsets = [0, 64], sizes = [16, 32], strides = [1, 1]} : vector<16x128xf32> to vector<16x32xf32>
    %102 = arith.negf %101 : vector<16x32xf32>
    %103 = math.exp %102 : vector<16x32xf32>
    %cst_44 = arith.constant 1.000000e+00 : f32
    %104 = vector.broadcast %cst_44 : f32 to vector<16x32xf32>
    %105 = arith.addf %104, %103 : vector<16x32xf32>
    %106 = arith.divf %104, %105 : vector<16x32xf32>
    %107 = vector.extract_strided_slice %88 {offsets = [0, 96], sizes = [16, 32], strides = [1, 1]} : vector<16x128xf32> to vector<16x32xf32>
    %108 = math.tanh %107 : vector<16x32xf32>
    %109 = arith.mulf %100, %80 : vector<16x32xf32>
    %110 = arith.mulf %94, %108 : vector<16x32xf32>
    %111 = arith.addf %109, %110 : vector<16x32xf32>
    %112 = math.tanh %111 : vector<16x32xf32>
    %113 = arith.mulf %106, %112 : vector<16x32xf32>
    %c0_45 = arith.constant 0 : index
    %c0_46 = arith.constant 0 : index
    %114 = vector.load %arg4[%c0_45, %c0_46] : memref<16x32xf32, #tpu.memory_space<vmem>>, vector<16x32xf32>
    tpu.vector_store %arg4[%c0_45, %c0_46], %113 {strides = array<i32>} : memref<16x32xf32, #tpu.memory_space<vmem>>, vector<16x32xf32>,
    %c0_47 = arith.constant 0 : index
    %c0_48 = arith.constant 0 : index
    %115 = vector.load %arg5[%c0_47, %c0_48] : memref<16x32xf32, #tpu.memory_space<vmem>>, vector<16x32xf32>
    tpu.vector_store %arg5[%c0_47, %c0_48], %111 {strides = array<i32>} : memref<16x32xf32, #tpu.memory_space<vmem>>, vector<16x32xf32>,
    %c3_i32 = arith.constant 3 : i32
    %c0_49 = arith.constant 0 : index
    %c0_50 = arith.constant 0 : index
    %116 = vector.load %arg4[%c0_49, %c0_50] : memref<16x32xf32, #tpu.memory_space<vmem>>, vector<16x32xf32>
    %c0_51 = arith.constant 0 : index
    %c0_52 = arith.constant 0 : index
    %117 = vector.load %arg5[%c0_51, %c0_52] : memref<16x32xf32, #tpu.memory_space<vmem>>, vector<16x32xf32>
    %118 = arith.truncf %116 : vector<16x32xf32> to vector<16x32xbf16>
    %cst_53 = arith.constant dense<0.000000e+00> : vector<16x32xf32>
    %119 = tpu.matmul %3, %118, %cst_53 {dimension_numbers = #tpu.dot_dimension_numbers<[1], [0], [0], [1], [0, 0, 1, 1], [], []>} : vector<16x16xbf16>, vector<16x32xbf16>, vector<16x32xf32> -> vector<16x32xf32>
    %120 = arith.truncf %119 : vector<16x32xf32> to vector<16x32xbf16>
    %cst_54 = arith.constant dense<0.000000e+00> : vector<16x128xf32>
    %121 = tpu.matmul %120, %4, %cst_54 {dimension_numbers = #tpu.dot_dimension_numbers<[1], [0], [0], [1], [0, 0, 1, 1], [], []>} : vector<16x32xbf16>, vector<32x128xbf16>, vector<16x128xf32> -> vector<16x128xf32>
    %122 = arith.index_cast %c3_i32 : i32 to index
    %c0_55 = arith.constant 0 : index
    %c0_56 = arith.constant 0 : index
    %123 = vector.load %arg1[%122, %c0_55, %c0_56] : memref<8x16x128xf32, #tpu.memory_space<vmem>>, vector<1x16x128xf32>
    %124 = vector.shape_cast %123 : vector<1x16x128xf32> to vector<16x128xf32>
    %125 = arith.addf %121, %124 : vector<16x128xf32>
    %126 = vector.extract_strided_slice %125 {offsets = [0, 0], sizes = [16, 32], strides = [1, 1]} : vector<16x128xf32> to vector<16x32xf32>
    %127 = arith.negf %126 : vector<16x32xf32>
    %128 = math.exp %127 : vector<16x32xf32>
    %cst_57 = arith.constant 1.000000e+00 : f32
    %129 = vector.broadcast %cst_57 : f32 to vector<16x32xf32>
    %130 = arith.addf %129, %128 : vector<16x32xf32>
    %131 = arith.divf %129, %130 : vector<16x32xf32>
    %132 = vector.extract_strided_slice %125 {offsets = [0, 32], sizes = [16, 32], strides = [1, 1]} : vector<16x128xf32> to vector<16x32xf32>
    %133 = arith.negf %132 : vector<16x32xf32>
    %134 = math.exp %133 : vector<16x32xf32>
    %cst_58 = arith.constant 1.000000e+00 : f32
    %135 = vector.broadcast %cst_58 : f32 to vector<16x32xf32>
    %136 = arith.addf %135, %134 : vector<16x32xf32>
    %137 = arith.divf %135, %136 : vector<16x32xf32>
    %138 = vector.extract_strided_slice %125 {offsets = [0, 64], sizes = [16, 32], strides = [1, 1]} : vector<16x128xf32> to vector<16x32xf32>
    %139 = arith.negf %138 : vector<16x32xf32>
    %140 = math.exp %139 : vector<16x32xf32>
    %cst_59 = arith.constant 1.000000e+00 : f32
    %141 = vector.broadcast %cst_59 : f32 to vector<16x32xf32>
    %142 = arith.addf %141, %140 : vector<16x32xf32>
    %143 = arith.divf %141, %142 : vector<16x32xf32>
    %144 = vector.extract_strided_slice %125 {offsets = [0, 96], sizes = [16, 32], strides = [1, 1]} : vector<16x128xf32> to vector<16x32xf32>
    %145 = math.tanh %144 : vector<16x32xf32>
    %146 = arith.mulf %137, %117 : vector<16x32xf32>
    %147 = arith.mulf %131, %145 : vector<16x32xf32>
    %148 = arith.addf %146, %147 : vector<16x32xf32>
    %149 = math.tanh %148 : vector<16x32xf32>
    %150 = arith.mulf %143, %149 : vector<16x32xf32>
    %c0_60 = arith.constant 0 : index
    %c0_61 = arith.constant 0 : index
    %151 = vector.load %arg4[%c0_60, %c0_61] : memref<16x32xf32, #tpu.memory_space<vmem>>, vector<16x32xf32>
    tpu.vector_store %arg4[%c0_60, %c0_61], %150 {strides = array<i32>} : memref<16x32xf32, #tpu.memory_space<vmem>>, vector<16x32xf32>,
    %c0_62 = arith.constant 0 : index
    %c0_63 = arith.constant 0 : index
    %152 = vector.load %arg5[%c0_62, %c0_63] : memref<16x32xf32, #tpu.memory_space<vmem>>, vector<16x32xf32>
    tpu.vector_store %arg5[%c0_62, %c0_63], %148 {strides = array<i32>} : memref<16x32xf32, #tpu.memory_space<vmem>>, vector<16x32xf32>,
    %c4_i32 = arith.constant 4 : i32
    %c0_64 = arith.constant 0 : index
    %c0_65 = arith.constant 0 : index
    %153 = vector.load %arg4[%c0_64, %c0_65] : memref<16x32xf32, #tpu.memory_space<vmem>>, vector<16x32xf32>
    %c0_66 = arith.constant 0 : index
    %c0_67 = arith.constant 0 : index
    %154 = vector.load %arg5[%c0_66, %c0_67] : memref<16x32xf32, #tpu.memory_space<vmem>>, vector<16x32xf32>
    %155 = arith.truncf %153 : vector<16x32xf32> to vector<16x32xbf16>
    %cst_68 = arith.constant dense<0.000000e+00> : vector<16x32xf32>
    %156 = tpu.matmul %3, %155, %cst_68 {dimension_numbers = #tpu.dot_dimension_numbers<[1], [0], [0], [1], [0, 0, 1, 1], [], []>} : vector<16x16xbf16>, vector<16x32xbf16>, vector<16x32xf32> -> vector<16x32xf32>
    %157 = arith.truncf %156 : vector<16x32xf32> to vector<16x32xbf16>
    %cst_69 = arith.constant dense<0.000000e+00> : vector<16x128xf32>
    %158 = tpu.matmul %157, %4, %cst_69 {dimension_numbers = #tpu.dot_dimension_numbers<[1], [0], [0], [1], [0, 0, 1, 1], [], []>} : vector<16x32xbf16>, vector<32x128xbf16>, vector<16x128xf32> -> vector<16x128xf32>
    %159 = arith.index_cast %c4_i32 : i32 to index
    %c0_70 = arith.constant 0 : index
    %c0_71 = arith.constant 0 : index
    %160 = vector.load %arg1[%159, %c0_70, %c0_71] : memref<8x16x128xf32, #tpu.memory_space<vmem>>, vector<1x16x128xf32>
    %161 = vector.shape_cast %160 : vector<1x16x128xf32> to vector<16x128xf32>
    %162 = arith.addf %158, %161 : vector<16x128xf32>
    %163 = vector.extract_strided_slice %162 {offsets = [0, 0], sizes = [16, 32], strides = [1, 1]} : vector<16x128xf32> to vector<16x32xf32>
    %164 = arith.negf %163 : vector<16x32xf32>
    %165 = math.exp %164 : vector<16x32xf32>
    %cst_72 = arith.constant 1.000000e+00 : f32
    %166 = vector.broadcast %cst_72 : f32 to vector<16x32xf32>
    %167 = arith.addf %166, %165 : vector<16x32xf32>
    %168 = arith.divf %166, %167 : vector<16x32xf32>
    %169 = vector.extract_strided_slice %162 {offsets = [0, 32], sizes = [16, 32], strides = [1, 1]} : vector<16x128xf32> to vector<16x32xf32>
    %170 = arith.negf %169 : vector<16x32xf32>
    %171 = math.exp %170 : vector<16x32xf32>
    %cst_73 = arith.constant 1.000000e+00 : f32
    %172 = vector.broadcast %cst_73 : f32 to vector<16x32xf32>
    %173 = arith.addf %172, %171 : vector<16x32xf32>
    %174 = arith.divf %172, %173 : vector<16x32xf32>
    %175 = vector.extract_strided_slice %162 {offsets = [0, 64], sizes = [16, 32], strides = [1, 1]} : vector<16x128xf32> to vector<16x32xf32>
    %176 = arith.negf %175 : vector<16x32xf32>
    %177 = math.exp %176 : vector<16x32xf32>
    %cst_74 = arith.constant 1.000000e+00 : f32
    %178 = vector.broadcast %cst_74 : f32 to vector<16x32xf32>
    %179 = arith.addf %178, %177 : vector<16x32xf32>
    %180 = arith.divf %178, %179 : vector<16x32xf32>
    %181 = vector.extract_strided_slice %162 {offsets = [0, 96], sizes = [16, 32], strides = [1, 1]} : vector<16x128xf32> to vector<16x32xf32>
    %182 = math.tanh %181 : vector<16x32xf32>
    %183 = arith.mulf %174, %154 : vector<16x32xf32>
    %184 = arith.mulf %168, %182 : vector<16x32xf32>
    %185 = arith.addf %183, %184 : vector<16x32xf32>
    %186 = math.tanh %185 : vector<16x32xf32>
    %187 = arith.mulf %180, %186 : vector<16x32xf32>
    %c0_75 = arith.constant 0 : index
    %c0_76 = arith.constant 0 : index
    %188 = vector.load %arg4[%c0_75, %c0_76] : memref<16x32xf32, #tpu.memory_space<vmem>>, vector<16x32xf32>
    tpu.vector_store %arg4[%c0_75, %c0_76], %187 {strides = array<i32>} : memref<16x32xf32, #tpu.memory_space<vmem>>, vector<16x32xf32>,
    %c0_77 = arith.constant 0 : index
    %c0_78 = arith.constant 0 : index
    %189 = vector.load %arg5[%c0_77, %c0_78] : memref<16x32xf32, #tpu.memory_space<vmem>>, vector<16x32xf32>
    tpu.vector_store %arg5[%c0_77, %c0_78], %185 {strides = array<i32>} : memref<16x32xf32, #tpu.memory_space<vmem>>, vector<16x32xf32>,
    %c5_i32 = arith.constant 5 : i32
    %c0_79 = arith.constant 0 : index
    %c0_80 = arith.constant 0 : index
    %190 = vector.load %arg4[%c0_79, %c0_80] : memref<16x32xf32, #tpu.memory_space<vmem>>, vector<16x32xf32>
    %c0_81 = arith.constant 0 : index
    %c0_82 = arith.constant 0 : index
    %191 = vector.load %arg5[%c0_81, %c0_82] : memref<16x32xf32, #tpu.memory_space<vmem>>, vector<16x32xf32>
    %192 = arith.truncf %190 : vector<16x32xf32> to vector<16x32xbf16>
    %cst_83 = arith.constant dense<0.000000e+00> : vector<16x32xf32>
    %193 = tpu.matmul %3, %192, %cst_83 {dimension_numbers = #tpu.dot_dimension_numbers<[1], [0], [0], [1], [0, 0, 1, 1], [], []>} : vector<16x16xbf16>, vector<16x32xbf16>, vector<16x32xf32> -> vector<16x32xf32>
    %194 = arith.truncf %193 : vector<16x32xf32> to vector<16x32xbf16>
    %cst_84 = arith.constant dense<0.000000e+00> : vector<16x128xf32>
    %195 = tpu.matmul %194, %4, %cst_84 {dimension_numbers = #tpu.dot_dimension_numbers<[1], [0], [0], [1], [0, 0, 1, 1], [], []>} : vector<16x32xbf16>, vector<32x128xbf16>, vector<16x128xf32> -> vector<16x128xf32>
    %196 = arith.index_cast %c5_i32 : i32 to index
    %c0_85 = arith.constant 0 : index
    %c0_86 = arith.constant 0 : index
    %197 = vector.load %arg1[%196, %c0_85, %c0_86] : memref<8x16x128xf32, #tpu.memory_space<vmem>>, vector<1x16x128xf32>
    %198 = vector.shape_cast %197 : vector<1x16x128xf32> to vector<16x128xf32>
    %199 = arith.addf %195, %198 : vector<16x128xf32>
    %200 = vector.extract_strided_slice %199 {offsets = [0, 0], sizes = [16, 32], strides = [1, 1]} : vector<16x128xf32> to vector<16x32xf32>
    %201 = arith.negf %200 : vector<16x32xf32>
    %202 = math.exp %201 : vector<16x32xf32>
    %cst_87 = arith.constant 1.000000e+00 : f32
    %203 = vector.broadcast %cst_87 : f32 to vector<16x32xf32>
    %204 = arith.addf %203, %202 : vector<16x32xf32>
    %205 = arith.divf %203, %204 : vector<16x32xf32>
    %206 = vector.extract_strided_slice %199 {offsets = [0, 32], sizes = [16, 32], strides = [1, 1]} : vector<16x128xf32> to vector<16x32xf32>
    %207 = arith.negf %206 : vector<16x32xf32>
    %208 = math.exp %207 : vector<16x32xf32>
    %cst_88 = arith.constant 1.000000e+00 : f32
    %209 = vector.broadcast %cst_88 : f32 to vector<16x32xf32>
    %210 = arith.addf %209, %208 : vector<16x32xf32>
    %211 = arith.divf %209, %210 : vector<16x32xf32>
    %212 = vector.extract_strided_slice %199 {offsets = [0, 64], sizes = [16, 32], strides = [1, 1]} : vector<16x128xf32> to vector<16x32xf32>
    %213 = arith.negf %212 : vector<16x32xf32>
    %214 = math.exp %213 : vector<16x32xf32>
    %cst_89 = arith.constant 1.000000e+00 : f32
    %215 = vector.broadcast %cst_89 : f32 to vector<16x32xf32>
    %216 = arith.addf %215, %214 : vector<16x32xf32>
    %217 = arith.divf %215, %216 : vector<16x32xf32>
    %218 = vector.extract_strided_slice %199 {offsets = [0, 96], sizes = [16, 32], strides = [1, 1]} : vector<16x128xf32> to vector<16x32xf32>
    %219 = math.tanh %218 : vector<16x32xf32>
    %220 = arith.mulf %211, %191 : vector<16x32xf32>
    %221 = arith.mulf %205, %219 : vector<16x32xf32>
    %222 = arith.addf %220, %221 : vector<16x32xf32>
    %223 = math.tanh %222 : vector<16x32xf32>
    %224 = arith.mulf %217, %223 : vector<16x32xf32>
    %c0_90 = arith.constant 0 : index
    %c0_91 = arith.constant 0 : index
    %225 = vector.load %arg4[%c0_90, %c0_91] : memref<16x32xf32, #tpu.memory_space<vmem>>, vector<16x32xf32>
    tpu.vector_store %arg4[%c0_90, %c0_91], %224 {strides = array<i32>} : memref<16x32xf32, #tpu.memory_space<vmem>>, vector<16x32xf32>,
    %c0_92 = arith.constant 0 : index
    %c0_93 = arith.constant 0 : index
    %226 = vector.load %arg5[%c0_92, %c0_93] : memref<16x32xf32, #tpu.memory_space<vmem>>, vector<16x32xf32>
    tpu.vector_store %arg5[%c0_92, %c0_93], %222 {strides = array<i32>} : memref<16x32xf32, #tpu.memory_space<vmem>>, vector<16x32xf32>,
    %c6_i32 = arith.constant 6 : i32
    %c0_94 = arith.constant 0 : index
    %c0_95 = arith.constant 0 : index
    %227 = vector.load %arg4[%c0_94, %c0_95] : memref<16x32xf32, #tpu.memory_space<vmem>>, vector<16x32xf32>
    %c0_96 = arith.constant 0 : index
    %c0_97 = arith.constant 0 : index
    %228 = vector.load %arg5[%c0_96, %c0_97] : memref<16x32xf32, #tpu.memory_space<vmem>>, vector<16x32xf32>
    %229 = arith.truncf %227 : vector<16x32xf32> to vector<16x32xbf16>
    %cst_98 = arith.constant dense<0.000000e+00> : vector<16x32xf32>
    %230 = tpu.matmul %3, %229, %cst_98 {dimension_numbers = #tpu.dot_dimension_numbers<[1], [0], [0], [1], [0, 0, 1, 1], [], []>} : vector<16x16xbf16>, vector<16x32xbf16>, vector<16x32xf32> -> vector<16x32xf32>
    %231 = arith.truncf %230 : vector<16x32xf32> to vector<16x32xbf16>
    %cst_99 = arith.constant dense<0.000000e+00> : vector<16x128xf32>
    %232 = tpu.matmul %231, %4, %cst_99 {dimension_numbers = #tpu.dot_dimension_numbers<[1], [0], [0], [1], [0, 0, 1, 1], [], []>} : vector<16x32xbf16>, vector<32x128xbf16>, vector<16x128xf32> -> vector<16x128xf32>
    %233 = arith.index_cast %c6_i32 : i32 to index
    %c0_100 = arith.constant 0 : index
    %c0_101 = arith.constant 0 : index
    %234 = vector.load %arg1[%233, %c0_100, %c0_101] : memref<8x16x128xf32, #tpu.memory_space<vmem>>, vector<1x16x128xf32>
    %235 = vector.shape_cast %234 : vector<1x16x128xf32> to vector<16x128xf32>
    %236 = arith.addf %232, %235 : vector<16x128xf32>
    %237 = vector.extract_strided_slice %236 {offsets = [0, 0], sizes = [16, 32], strides = [1, 1]} : vector<16x128xf32> to vector<16x32xf32>
    %238 = arith.negf %237 : vector<16x32xf32>
    %239 = math.exp %238 : vector<16x32xf32>
    %cst_102 = arith.constant 1.000000e+00 : f32
    %240 = vector.broadcast %cst_102 : f32 to vector<16x32xf32>
    %241 = arith.addf %240, %239 : vector<16x32xf32>
    %242 = arith.divf %240, %241 : vector<16x32xf32>
    %243 = vector.extract_strided_slice %236 {offsets = [0, 32], sizes = [16, 32], strides = [1, 1]} : vector<16x128xf32> to vector<16x32xf32>
    %244 = arith.negf %243 : vector<16x32xf32>
    %245 = math.exp %244 : vector<16x32xf32>
    %cst_103 = arith.constant 1.000000e+00 : f32
    %246 = vector.broadcast %cst_103 : f32 to vector<16x32xf32>
    %247 = arith.addf %246, %245 : vector<16x32xf32>
    %248 = arith.divf %246, %247 : vector<16x32xf32>
    %249 = vector.extract_strided_slice %236 {offsets = [0, 64], sizes = [16, 32], strides = [1, 1]} : vector<16x128xf32> to vector<16x32xf32>
    %250 = arith.negf %249 : vector<16x32xf32>
    %251 = math.exp %250 : vector<16x32xf32>
    %cst_104 = arith.constant 1.000000e+00 : f32
    %252 = vector.broadcast %cst_104 : f32 to vector<16x32xf32>
    %253 = arith.addf %252, %251 : vector<16x32xf32>
    %254 = arith.divf %252, %253 : vector<16x32xf32>
    %255 = vector.extract_strided_slice %236 {offsets = [0, 96], sizes = [16, 32], strides = [1, 1]} : vector<16x128xf32> to vector<16x32xf32>
    %256 = math.tanh %255 : vector<16x32xf32>
    %257 = arith.mulf %248, %228 : vector<16x32xf32>
    %258 = arith.mulf %242, %256 : vector<16x32xf32>
    %259 = arith.addf %257, %258 : vector<16x32xf32>
    %260 = math.tanh %259 : vector<16x32xf32>
    %261 = arith.mulf %254, %260 : vector<16x32xf32>
    %c0_105 = arith.constant 0 : index
    %c0_106 = arith.constant 0 : index
    %262 = vector.load %arg4[%c0_105, %c0_106] : memref<16x32xf32, #tpu.memory_space<vmem>>, vector<16x32xf32>
    tpu.vector_store %arg4[%c0_105, %c0_106], %261 {strides = array<i32>} : memref<16x32xf32, #tpu.memory_space<vmem>>, vector<16x32xf32>,
    %c0_107 = arith.constant 0 : index
    %c0_108 = arith.constant 0 : index
    %263 = vector.load %arg5[%c0_107, %c0_108] : memref<16x32xf32, #tpu.memory_space<vmem>>, vector<16x32xf32>
    tpu.vector_store %arg5[%c0_107, %c0_108], %259 {strides = array<i32>} : memref<16x32xf32, #tpu.memory_space<vmem>>, vector<16x32xf32>,
    %c7_i32 = arith.constant 7 : i32
    %c0_109 = arith.constant 0 : index
    %c0_110 = arith.constant 0 : index
    %264 = vector.load %arg4[%c0_109, %c0_110] : memref<16x32xf32, #tpu.memory_space<vmem>>, vector<16x32xf32>
    %c0_111 = arith.constant 0 : index
    %c0_112 = arith.constant 0 : index
    %265 = vector.load %arg5[%c0_111, %c0_112] : memref<16x32xf32, #tpu.memory_space<vmem>>, vector<16x32xf32>
    %266 = arith.truncf %264 : vector<16x32xf32> to vector<16x32xbf16>
    %cst_113 = arith.constant dense<0.000000e+00> : vector<16x32xf32>
    %267 = tpu.matmul %3, %266, %cst_113 {dimension_numbers = #tpu.dot_dimension_numbers<[1], [0], [0], [1], [0, 0, 1, 1], [], []>} : vector<16x16xbf16>, vector<16x32xbf16>, vector<16x32xf32> -> vector<16x32xf32>
    %268 = arith.truncf %267 : vector<16x32xf32> to vector<16x32xbf16>
    %cst_114 = arith.constant dense<0.000000e+00> : vector<16x128xf32>
    %269 = tpu.matmul %268, %4, %cst_114 {dimension_numbers = #tpu.dot_dimension_numbers<[1], [0], [0], [1], [0, 0, 1, 1], [], []>} : vector<16x32xbf16>, vector<32x128xbf16>, vector<16x128xf32> -> vector<16x128xf32>
    %270 = arith.index_cast %c7_i32 : i32 to index
    %c0_115 = arith.constant 0 : index
    %c0_116 = arith.constant 0 : index
    %271 = vector.load %arg1[%270, %c0_115, %c0_116] : memref<8x16x128xf32, #tpu.memory_space<vmem>>, vector<1x16x128xf32>
    %272 = vector.shape_cast %271 : vector<1x16x128xf32> to vector<16x128xf32>
    %273 = arith.addf %269, %272 : vector<16x128xf32>
    %274 = vector.extract_strided_slice %273 {offsets = [0, 0], sizes = [16, 32], strides = [1, 1]} : vector<16x128xf32> to vector<16x32xf32>
    %275 = arith.negf %274 : vector<16x32xf32>
    %276 = math.exp %275 : vector<16x32xf32>
    %cst_117 = arith.constant 1.000000e+00 : f32
    %277 = vector.broadcast %cst_117 : f32 to vector<16x32xf32>
    %278 = arith.addf %277, %276 : vector<16x32xf32>
    %279 = arith.divf %277, %278 : vector<16x32xf32>
    %280 = vector.extract_strided_slice %273 {offsets = [0, 32], sizes = [16, 32], strides = [1, 1]} : vector<16x128xf32> to vector<16x32xf32>
    %281 = arith.negf %280 : vector<16x32xf32>
    %282 = math.exp %281 : vector<16x32xf32>
    %cst_118 = arith.constant 1.000000e+00 : f32
    %283 = vector.broadcast %cst_118 : f32 to vector<16x32xf32>
    %284 = arith.addf %283, %282 : vector<16x32xf32>
    %285 = arith.divf %283, %284 : vector<16x32xf32>
    %286 = vector.extract_strided_slice %273 {offsets = [0, 64], sizes = [16, 32], strides = [1, 1]} : vector<16x128xf32> to vector<16x32xf32>
    %287 = arith.negf %286 : vector<16x32xf32>
    %288 = math.exp %287 : vector<16x32xf32>
    %cst_119 = arith.constant 1.000000e+00 : f32
    %289 = vector.broadcast %cst_119 : f32 to vector<16x32xf32>
    %290 = arith.addf %289, %288 : vector<16x32xf32>
    %291 = arith.divf %289, %290 : vector<16x32xf32>
    %292 = vector.extract_strided_slice %273 {offsets = [0, 96], sizes = [16, 32], strides = [1, 1]} : vector<16x128xf32> to vector<16x32xf32>
    %293 = math.tanh %292 : vector<16x32xf32>
    %294 = arith.mulf %285, %265 : vector<16x32xf32>
    %295 = arith.mulf %279, %293 : vector<16x32xf32>
    %296 = arith.addf %294, %295 : vector<16x32xf32>
    %297 = math.tanh %296 : vector<16x32xf32>
    %298 = arith.mulf %291, %297 : vector<16x32xf32>
    %c0_120 = arith.constant 0 : index
    %c0_121 = arith.constant 0 : index
    %299 = vector.load %arg4[%c0_120, %c0_121] : memref<16x32xf32, #tpu.memory_space<vmem>>, vector<16x32xf32>
    tpu.vector_store %arg4[%c0_120, %c0_121], %298 {strides = array<i32>} : memref<16x32xf32, #tpu.memory_space<vmem>>, vector<16x32xf32>,
    %c0_122 = arith.constant 0 : index
    %c0_123 = arith.constant 0 : index
    %300 = vector.load %arg5[%c0_122, %c0_123] : memref<16x32xf32, #tpu.memory_space<vmem>>, vector<16x32xf32>
    tpu.vector_store %arg5[%c0_122, %c0_123], %296 {strides = array<i32>} : memref<16x32xf32, #tpu.memory_space<vmem>>, vector<16x32xf32>,
    %c8_i32 = arith.constant 8 : i32
    return
  }
  func.func @transform_0(%arg0: i32) -> (i32, i32, i32) {
    %c0_i32 = arith.constant 0 : i32
    %c0_i32_0 = arith.constant 0 : i32
    %c0_i32_1 = arith.constant 0 : i32
    return %arg0, %c0_i32, %c0_i32_0 : i32, i32, i32
  }
  func.func @transform_1(%arg0: i32) -> (i32, i32) {
    %c0_i32 = arith.constant 0 : i32
    %c0_i32_0 = arith.constant 0 : i32
    %c0_i32_1 = arith.constant 0 : i32
    return %c0_i32, %c0_i32_0 : i32, i32
  }
  func.func @transform_2(%arg0: i32) -> (i32, i32) {
    %c0_i32 = arith.constant 0 : i32
    %c0_i32_0 = arith.constant 0 : i32
    %c0_i32_1 = arith.constant 0 : i32
    return %c0_i32, %c0_i32_0 : i32, i32
  }
  func.func @transform_3(%arg0: i32) -> (i32, i32) {
    %c0_i32 = arith.constant 0 : i32
    %c0_i32_0 = arith.constant 0 : i32
    %c0_i32_1 = arith.constant 0 : i32
    return %c0_i32, %c0_i32_0 : i32, i32
  }
  func.func @transform_4(%arg0: i32) -> (i32, i32) {
    %c0_i32 = arith.constant 0 : i32
    %c0_i32_0 = arith.constant 0 : i32
    %c0_i32_1 = arith.constant 0 : i32
    return %c0_i32, %c0_i32_0 : i32, i32
  }
}

</mosaic_0001>

<bundles_post_ra>
// kernel: gconvlstm_encoder.1
= control target key start
LH: loop header
LB: loop body
LE: loop exit
PB: predicated region body
PF: predicated region fallthrough
CT: control target
= control target key end

     0   :  { %10 = vsyncpa [#allocation3], 0  ;;  %vm23_vm0 = vcmask 261120   ;;  %v1839_v0 = vmov 0.0   ;;  %vm1840_vm1 = vmmov 0   ;;  %s2201_s0 = inlined_call_operand.vmem [shape: f32[8,16,128], index: 0, kind: input, shape index: {}]   ;;  %s2202_s1 = inlined_call_operand.vmem [shape: bf16[16,16], index: 1, kind: input, shape index: {}]   ;;  %s2203_s2 = inlined_call_operand.vmem [shape: bf16[32,128], index: 2, kind: input, shape index: {}]   ;;  %s2204_s3 = inlined_call_operand.hbm [shape: f32[16,32], index: 3, kind: output, shape index: {0}]   ;;  %s2205_s4 = inlined_call_operand.hbm [shape: f32[16,32], index: 4, kind: output, shape index: {1}]  }
   0x1   :  { %1536 = vmatprep.subr.bf16.mxu0 %v1839_v0  ;;  %24 = vst.msk [vmem:[#allocation2] sm:$0xff] %vm23_vm0, %v1839_v0  ;;  %25 = vst.msk [vmem:[#allocation2 + $0x8] sm:$0xff] %vm23_vm0, %v1839_v0  ;;  %1538 = vmatprep.mubr.msk.bf16.mxu0 %vm1840_vm1, %v1839_v0  ;;  %v1887_v1 = vld [vmem:[%s2203_s2] sm:$0xff]  }
   0x2   :  { %26 = vst.msk [vmem:[#allocation4] sm:$0xff] %vm23_vm0, %v1839_v0  ;;  %27 = vst.msk [vmem:[#allocation4 + $0x8] sm:$0xff] %vm23_vm0, %v1839_v0  ;;  %1542 = vmatprep.subr.bf16.mxu1 %v1839_v0  ;;  %1546 = vmatprep.mubr.msk.bf16.mxu1 %vm1840_vm1, %v1839_v0 }
   0x3   :  { %1543 = vmatpush3.bf16.msra.mxu1 %v1887_v1 }
   0x4   :  { %11 = vsyncpa [#allocation5], 0  ;;  %1544 = vmatprep.subr.bf16.mxu1 %v1839_v0  ;;  %v1897_v5 = vld [vmem:[%s2202_s1] sm:$0xff]   ;;  %vm44_vm2 = vcmask 130048   ;;  %v1907_v6 = vld [vmem:[%s2203_s2 + $0x8] sm:$0xff]   ;;  %s1841_s21 = smov 32  }
   0x5   :  { %v90_v14 = vld [vmem:[%s2201_s0] sm:$0xff]  ;;  %v91_v16 = vld [vmem:[%s2201_s0 + $0x8] sm:$0xff]  ;;  %s1842_s26 = smov 64   ;;  %s1843_s27 = smov 96   ;;  %v1455_v62 = vld [vmem:[%s2201_s0 + $0x10] sm:$0xff] }
   0x7   :  { %1545 = vmatpush3.bf16.msra.mxu1 %v1907_v6 }
   0x8   :  { %v34_v2 = vld [vmem:[#allocation2] sm:$0xff]  ;;  %v35_v3 = vld [vmem:[#allocation2 + $0x8] sm:$0xff]  ;;  %1556 = vmatprep.subr.bf16.mxu1 %v1839_v0 }
   0x9   :  { %v38_v4 = vpack.c.bf16 %v35_v3, %v34_v2  ;;  %v36_v7 = vld [vmem:[#allocation4] sm:$0xff]  ;;  %v37_v8 = vld [vmem:[#allocation4 + $0x8] sm:$0xff] }
   0xa   :  { %165 = vrot.lane.b32.xlu1 %v36_v7, %s1841_s21  ;;  %v1456_v2 = vld [vmem:[%s2201_s0 + $0x18] sm:$0xff] }
   0xb   :  { %1537 = vmatpush3.bf16.msra.mxu0 %v38_v4 }
   0xc   :  { %1550 = vmatprep.subr.bf16.mxu0 %v1839_v0 }
   0xe   :  { %1539 = vmatmul.mubr.msk.bf16.vlgmr.msra.gmra.mrb[0].mxu0 %vm44_vm2, %v1897_v5  ;;  %167 = vrot.lane.b32.xlu1 %v37_v8, %s1841_s21 }
   0xf   :  { %1552 = vmatprep.mubr.msk.bf16.mxu0 %vm1840_vm1, %v1839_v0 }
  0x7c   :  { %v166_v36 = vpop.permute.xlu1 %165 }
  0x80   :  { %v168_v38 = vpop.permute.xlu1 %167 }
  0xe1   :  { %v82_v9 = vpop.f32.mrb[0].mxu0 }
  0xe2   :  { %v1540_v10 = vpop.f32.mrb[1].mxu0 }
  0xe3   :  { %v85_v11 = vpop.f32.mrb[2].mxu0 }
  0xe4   :  { %v89_v12 = vpack.c.bf16 %v85_v11, %v82_v9  ;;  %v1541_v13 = vpop.f32.mrb[3].mxu0 }
  0xe6   :  { %1547 = vmatmul.mubr.msk.bf16.vlgmr.msra.gmra.mrb[0].mxu1 %vm23_vm0, %v89_v12 }
  0xe7   :  { %1557 = vmatpush3.bf16.msra.mxu1 %v1887_v1  ;;  %1560 = vmatprep.mubr.msk.bf16.mxu1 %vm1840_vm1, %v1839_v0 }
  0xe8   :  { %1558 = vmatprep.subr.bf16.mxu1 %v1839_v0 }
  0xeb   :  { %1559 = vmatpush3.bf16.msra.mxu1 %v1907_v6 }
  0xec   :  { %1570 = vmatprep.subr.bf16.mxu1 %v1839_v0 }
 0x1b9   :  { %v142_v15 = vpop.f32.mrb[0].mxu1 }
 0x1ba   :  { %v143_v17 = vadd.f32 %v142_v15, %v90_v14  ;;  %v1548_v18 = vpop.f32.mrb[1].mxu1 }
 0x1bb   :  { %v145_v19 = vpop.f32.mrb[2].mxu1 }
 0x1bc   :  { %1660 = vtanh.f32 %v143_v17  ;;  %v146_v20 = vadd.f32 %v145_v19, %v91_v16  ;;  %v1549_v21 = vpop.f32.mrb[3].mxu1  ;;  %v1452_v24 = vmul.f32 -1.442695, %v143_v17 }
 0x1be   :  { %1662 = vtanh.f32 %v146_v20  ;;  %v1453_v25 = vmul.f32 -1.442695, %v146_v20 }
 0x1bf   :  { %1664 = vpow2.f32 %v1452_v24 }
 0x1c0   :  { %1666 = vpow2.f32 %v1453_v25 }
 0x1c6   :  { %v1661_v22 = vpop.eup %1660 }
 0x1c7   :  { %175 = vrot.lane.b32.xlu0 %v1661_v22, %s1841_s21 }
 0x1c8   :  { %v1663_v23 = vpop.eup %1662 }
 0x1c9   :  { %v1665_v26 = vpop.eup %1664 }
 0x1ca   :  { %v155_v27 = vadd.f32 1.0, %v1665_v26  ;;  %v1667_v28 = vpop.eup %1666 }
 0x1cb   :  { %177 = vrot.lane.b32.xlu0 %v1663_v23, %s1841_s21  ;;  %v156_v29 = vadd.f32 1.0, %v1667_v28 }
 0x1cc   :  { %1668 = vrcp.f32 %v155_v27 }
 0x1cd   :  { %1670 = vrcp.f32 %v156_v29 }
 0x1d6   :  { %v1669_v30 = vpop.eup %1668 }
 0x1d7   :  { %v1671_v33 = vpop.eup %1670  ;;  %v171_v37 = vmul.f32 %v1669_v30, %v166_v36 }
 0x1d8   :  { %v172_v41 = vmul.f32 %v1671_v33, %v168_v38 }
 0x239   :  { %v176_v31 = vpop.permute.xlu0 %175 }
 0x23a   :  { %v181_v32 = vmul.f32 %v1669_v30, %v176_v31 }
 0x23c   :  { %185 = vrot.lane.b32.xlu0 %v181_v32, %s1841_s21 }
 0x23d   :  { %v178_v34 = vpop.permute.xlu0 %177 }
 0x23e   :  { %v182_v35 = vmul.f32 %v1671_v33, %v178_v34 }
 0x240   :  { %187 = vrot.lane.b32.xlu1 %v182_v35, %s1841_s21 }
 0x2ae   :  { %v186_v39 = vpop.permute.xlu0 %185 }
 0x2af   :  { %v191_v40 = vadd.f32 %v186_v39, %v171_v37 }
 0x2b1   :  { %1672 = vtanh.f32 %v191_v40 }
 0x2b2   :  { %v188_v42 = vpop.permute.xlu1 %187 }
 0x2b3   :  { %v192_v43 = vadd.f32 %v188_v42, %v172_v41 }
 0x2b5   :  { %1674 = vtanh.f32 %v192_v43 }
 0x2bb   :  { %v1673_v44 = vpop.eup %1672 }
 0x2bc   :  { %197 = vrot.lane.b32.xlu0 %v1673_v44, %s1841_s21 }
 0x2bf   :  { %v1675_v45 = vpop.eup %1674 }
 0x2c0   :  { %199 = vrot.lane.b32.xlu1 %v1675_v45, %s1841_s21 }
 0x32e   :  { %v198_v46 = vpop.permute.xlu0 %197 }
 0x32f   :  { %v203_v47 = vmul.f32 %v1669_v30, %v198_v46 }
 0x331   :  { %207 = vrot.lane.b32.xlu0 %v203_v47, %s1842_s26 }
 0x332   :  { %v200_v48 = vpop.permute.xlu1 %199 }
 0x333   :  { %v204_v49 = vmul.f32 %v1671_v33, %v200_v48 }
 0x335   :  { %217 = vrot.lane.b32.xlu0 %v191_v40, %s1843_s27  ;;  %209 = vrot.lane.b32.xlu1 %v204_v49, %s1842_s26 }
 0x339   :  { %219 = vrot.lane.b32.xlu1 %v192_v43, %s1843_s27 }
 0x3a3   :  { %v208_v50 = vpop.permute.xlu0 %207 }
 0x3a4   :  { %213 = vst.msk [vmem:[#allocation2] sm:$0xff] %vm23_vm0, %v208_v50 }
 0x3a7   :  { %v218_v51 = vpop.permute.xlu0 %217  ;;  %v210_v52 = vpop.permute.xlu1 %209 }
 0x3a8   :  { %223 = vst.msk [vmem:[#allocation4] sm:$0xff] %vm23_vm0, %v218_v51  ;;  %214 = vst.msk [vmem:[#allocation2 + $0x8] sm:$0xff] %vm23_vm0, %v210_v52  ;;  %v1461_v52 = vld [vmem:[%s2201_s0 + $0x20] sm:$0xff] }
 0x3ab   :  { %v220_v53 = vpop.permute.xlu1 %219  ;;  %v225_v54 = vld [vmem:[#allocation2] sm:$0xff] }
 0x3ac   :  { %224 = vst.msk [vmem:[#allocation4 + $0x8] sm:$0xff] %vm23_vm0, %v220_v53 }
 0x3af   :  { %v226_v55 = vld [vmem:[#allocation2 + $0x8] sm:$0xff]  ;;  %v227_v12 = vld [vmem:[#allocation4] sm:$0xff] }
 0x3b0   :  { %v229_v56 = vpack.c.bf16 %v226_v55, %v225_v54  ;;  %v1462_v54 = vld [vmem:[%s2201_s0 + $0x28] sm:$0xff] }
 0x3b2   :  { %1551 = vmatpush3.bf16.msra.mxu0 %v229_v56 }
 0x3b3   :  { %1564 = vmatprep.subr.bf16.mxu0 %v1839_v0  ;;  %v228_v13 = vld [vmem:[#allocation4 + $0x8] sm:$0xff] }
 0x3b5   :  { %1553 = vmatmul.mubr.msk.bf16.vlgmr.msra.gmra.mrb[4].mxu0 %vm44_vm2, %v1897_v5 }
 0x3b6   :  { %1566 = vmatprep.mubr.msk.bf16.mxu0 %vm1840_vm1, %v1839_v0 }
 0x488   :  { %v264_v57 = vpop.f32.mrb[4].mxu0 }
 0x489   :  { %v1554_v58 = vpop.f32.mrb[5].mxu0 }
 0x48a   :  { %v267_v59 = vpop.f32.mrb[6].mxu0 }
 0x48b   :  { %v271_v60 = vpack.c.bf16 %v267_v59, %v264_v57  ;;  %v1555_v61 = vpop.f32.mrb[7].mxu0 }
 0x48d   :  { %1561 = vmatmul.mubr.msk.bf16.vlgmr.msra.gmra.mrb[4].mxu1 %vm23_vm0, %v271_v60 }
 0x48e   :  { %1571 = vmatpush3.bf16.msra.mxu1 %v1887_v1  ;;  %1574 = vmatprep.mubr.msk.bf16.mxu1 %vm1840_vm1, %v1839_v0 }
 0x48f   :  { %1572 = vmatprep.subr.bf16.mxu1 %v1839_v0 }
 0x492   :  { %1573 = vmatpush3.bf16.msra.mxu1 %v1907_v6 }
 0x493   :  { %1584 = vmatprep.subr.bf16.mxu1 %v1839_v0 }
 0x560   :  { %v312_v63 = vpop.f32.mrb[4].mxu1 }
 0x561   :  { %v313_v3 = vadd.f32 %v1455_v62, %v312_v63  ;;  %v1562_v4 = vpop.f32.mrb[5].mxu1 }
 0x562   :  { %v315_v7 = vpop.f32.mrb[6].mxu1 }
 0x563   :  { %1676 = vtanh.f32 %v313_v3  ;;  %v316_v8 = vadd.f32 %v1456_v2, %v315_v7  ;;  %v1563_v9 = vpop.f32.mrb[7].mxu1  ;;  %v1458_v14 = vmul.f32 -1.442695, %v313_v3 }
 0x565   :  { %1678 = vtanh.f32 %v316_v8  ;;  %v1459_v15 = vmul.f32 -1.442695, %v316_v8 }
 0x566   :  { %1680 = vpow2.f32 %v1458_v14 }
 0x567   :  { %1682 = vpow2.f32 %v1459_v15 }
 0x56d   :  { %v1677_v10 = vpop.eup %1676 }
 0x56e   :  { %345 = vrot.lane.b32.xlu0 %v1677_v10, %s1841_s21 }
 0x56f   :  { %v1679_v11 = vpop.eup %1678 }
 0x570   :  { %347 = vrot.lane.b32.xlu1 %v1679_v11, %s1841_s21  ;;  %v1681_v16 = vpop.eup %1680 }
 0x571   :  { %v1683_v17 = vpop.eup %1682  ;;  %v325_v18 = vadd.f32 1.0, %v1681_v16 }
 0x572   :  { %335 = vrot.lane.b32.xlu0 %v227_v12, %s1841_s21  ;;  %v326_v19 = vadd.f32 1.0, %v1683_v17 }
 0x573   :  { %1684 = vrcp.f32 %v325_v18 }
 0x574   :  { %337 = vrot.lane.b32.xlu1 %v228_v13, %s1841_s21  ;;  %1686 = vrcp.f32 %v326_v19 }
 0x57d   :  { %v1685_v20 = vpop.eup %1684 }
 0x57e   :  { %v1687_v23 = vpop.eup %1686 }
 0x5e0   :  { %v346_v21 = vpop.permute.xlu0 %345 }
 0x5e1   :  { %v351_v22 = vmul.f32 %v1685_v20, %v346_v21 }
 0x5e2   :  { %v348_v24 = vpop.permute.xlu1 %347 }
 0x5e3   :  { %355 = vrot.lane.b32.xlu0 %v351_v22, %s1841_s21  ;;  %v352_v25 = vmul.f32 %v1687_v23, %v348_v24 }
 0x5e4   :  { %v336_v26 = vpop.permute.xlu0 %335 }
 0x5e5   :  { %357 = vrot.lane.b32.xlu1 %v352_v25, %s1841_s21  ;;  %v341_v27 = vmul.f32 %v1685_v20, %v336_v26 }
 0x5e6   :  { %v338_v28 = vpop.permute.xlu1 %337 }
 0x5e7   :  { %v342_v31 = vmul.f32 %v1687_v23, %v338_v28 }
 0x655   :  { %v356_v29 = vpop.permute.xlu0 %355 }
 0x656   :  { %v361_v30 = vadd.f32 %v356_v29, %v341_v27 }
 0x657   :  { %v358_v32 = vpop.permute.xlu1 %357 }
 0x658   :  { %1688 = vtanh.f32 %v361_v30  ;;  %v362_v33 = vadd.f32 %v358_v32, %v342_v31 }
 0x65a   :  { %1690 = vtanh.f32 %v362_v33 }
 0x662   :  { %v1689_v34 = vpop.eup %1688 }
 0x663   :  { %367 = vrot.lane.b32.xlu0 %v1689_v34, %s1841_s21 }
 0x664   :  { %v1691_v35 = vpop.eup %1690 }
 0x665   :  { %369 = vrot.lane.b32.xlu1 %v1691_v35, %s1841_s21 }
 0x6d5   :  { %v368_v36 = vpop.permute.xlu0 %367 }
 0x6d6   :  { %v373_v37 = vmul.f32 %v1685_v20, %v368_v36 }
 0x6d7   :  { %v370_v38 = vpop.permute.xlu1 %369 }
 0x6d8   :  { %377 = vrot.lane.b32.xlu0 %v373_v37, %s1842_s26  ;;  %v374_v39 = vmul.f32 %v1687_v23, %v370_v38 }
 0x6da   :  { %379 = vrot.lane.b32.xlu1 %v374_v39, %s1842_s26 }
 0x6dc   :  { %387 = vrot.lane.b32.xlu0 %v361_v30, %s1843_s27 }
 0x6de   :  { %389 = vrot.lane.b32.xlu1 %v362_v33, %s1843_s27 }
 0x74a   :  { %v378_v40 = vpop.permute.xlu0 %377 }
 0x74b   :  { %383 = vst.msk [vmem:[#allocation2] sm:$0xff] %vm23_vm0, %v378_v40 }
 0x74c   :  { %v380_v41 = vpop.permute.xlu1 %379 }
 0x74d   :  { %384 = vst.msk [vmem:[#allocation2 + $0x8] sm:$0xff] %vm23_vm0, %v380_v41 }
 0x74e   :  { %v388_v42 = vpop.permute.xlu0 %387 }
 0x74f   :  { %393 = vst.msk [vmem:[#allocation4] sm:$0xff] %vm23_vm0, %v388_v42  ;;  %v1467_v42 = vld [vmem:[%s2201_s0 + $0x30] sm:$0xff] }
 0x750   :  { %v390_v43 = vpop.permute.xlu1 %389 }
 0x751   :  { %394 = vst.msk [vmem:[#allocation4 + $0x8] sm:$0xff] %vm23_vm0, %v390_v43 }
 0x752   :  { %v395_v44 = vld [vmem:[#allocation2] sm:$0xff] }
 0x754   :  { %v396_v45 = vld [vmem:[#allocation2 + $0x8] sm:$0xff] }
 0x755   :  { %v399_v46 = vpack.c.bf16 %v396_v45, %v395_v44  ;;  %v1468_v44 = vld [vmem:[%s2201_s0 + $0x38] sm:$0xff] }
 0x756   :  { %v397_v62 = vld [vmem:[#allocation4] sm:$0xff] }
 0x757   :  { %1565 = vmatpush3.bf16.msra.mxu0 %v399_v46 }
 0x758   :  { %1578 = vmatprep.subr.bf16.mxu0 %v1839_v0  ;;  %v398_v63 = vld [vmem:[#allocation4 + $0x8] sm:$0xff] }
 0x75a   :  { %1567 = vmatmul.mubr.msk.bf16.vlgmr.msra.gmra.mrb[8].mxu0 %vm44_vm2, %v1897_v5 }
 0x75b   :  { %1580 = vmatprep.mubr.msk.bf16.mxu0 %vm1840_vm1, %v1839_v0 }
 0x82d   :  { %v434_v47 = vpop.f32.mrb[8].mxu0 }
 0x82e   :  { %v1568_v48 = vpop.f32.mrb[9].mxu0 }
 0x82f   :  { %v437_v49 = vpop.f32.mrb[10].mxu0 }
 0x830   :  { %v441_v50 = vpack.c.bf16 %v437_v49, %v434_v47  ;;  %v1569_v51 = vpop.f32.mrb[11].mxu0 }
 0x832   :  { %1575 = vmatmul.mubr.msk.bf16.vlgmr.msra.gmra.mrb[8].mxu1 %vm23_vm0, %v441_v50 }
 0x833   :  { %1585 = vmatpush3.bf16.msra.mxu1 %v1887_v1  ;;  %1588 = vmatprep.mubr.msk.bf16.mxu1 %vm1840_vm1, %v1839_v0 }
 0x834   :  { %1586 = vmatprep.subr.bf16.mxu1 %v1839_v0 }
 0x837   :  { %1587 = vmatpush3.bf16.msra.mxu1 %v1907_v6 }
 0x838   :  { %1598 = vmatprep.subr.bf16.mxu1 %v1839_v0 }
 0x905   :  { %v482_v53 = vpop.f32.mrb[8].mxu1 }
 0x906   :  { %v483_v55 = vadd.f32 %v1461_v52, %v482_v53  ;;  %v1576_v56 = vpop.f32.mrb[9].mxu1 }
 0x907   :  { %v485_v57 = vpop.f32.mrb[10].mxu1 }
 0x908   :  { %1692 = vtanh.f32 %v483_v55  ;;  %v486_v58 = vadd.f32 %v1462_v54, %v485_v57  ;;  %v1577_v59 = vpop.f32.mrb[11].mxu1  ;;  %v1464_v2 = vmul.f32 -1.442695, %v483_v55 }
 0x90a   :  { %1694 = vtanh.f32 %v486_v58  ;;  %v1465_v3 = vmul.f32 -1.442695, %v486_v58 }
 0x90b   :  { %1696 = vpow2.f32 %v1464_v2 }
 0x90c   :  { %1698 = vpow2.f32 %v1465_v3 }
 0x912   :  { %v1693_v60 = vpop.eup %1692 }
 0x913   :  { %515 = vrot.lane.b32.xlu0 %v1693_v60, %s1841_s21 }
 0x914   :  { %v1695_v61 = vpop.eup %1694 }
 0x915   :  { %517 = vrot.lane.b32.xlu1 %v1695_v61, %s1841_s21  ;;  %v1697_v4 = vpop.eup %1696 }
 0x916   :  { %v1699_v7 = vpop.eup %1698  ;;  %v495_v8 = vadd.f32 1.0, %v1697_v4 }
 0x917   :  { %505 = vrot.lane.b32.xlu0 %v397_v62, %s1841_s21  ;;  %v496_v9 = vadd.f32 1.0, %v1699_v7 }
 0x918   :  { %1700 = vrcp.f32 %v495_v8 }
 0x919   :  { %507 = vrot.lane.b32.xlu1 %v398_v63, %s1841_s21  ;;  %1702 = vrcp.f32 %v496_v9 }
 0x922   :  { %v1701_v10 = vpop.eup %1700 }
 0x923   :  { %v1703_v13 = vpop.eup %1702 }
 0x985   :  { %v516_v11 = vpop.permute.xlu0 %515 }
 0x986   :  { %v521_v12 = vmul.f32 %v1701_v10, %v516_v11 }
 0x987   :  { %v518_v14 = vpop.permute.xlu1 %517 }
 0x988   :  { %525 = vrot.lane.b32.xlu0 %v521_v12, %s1841_s21  ;;  %v522_v15 = vmul.f32 %v1703_v13, %v518_v14 }
 0x989   :  { %v506_v16 = vpop.permute.xlu0 %505 }
 0x98a   :  { %527 = vrot.lane.b32.xlu1 %v522_v15, %s1841_s21  ;;  %v511_v17 = vmul.f32 %v1701_v10, %v506_v16 }
 0x98b   :  { %v508_v18 = vpop.permute.xlu1 %507 }
 0x98c   :  { %v512_v21 = vmul.f32 %v1703_v13, %v508_v18 }
 0x9fa   :  { %v526_v19 = vpop.permute.xlu0 %525 }
 0x9fb   :  { %v531_v20 = vadd.f32 %v526_v19, %v511_v17 }
 0x9fc   :  { %v528_v22 = vpop.permute.xlu1 %527 }
 0x9fd   :  { %1704 = vtanh.f32 %v531_v20  ;;  %v532_v23 = vadd.f32 %v528_v22, %v512_v21 }
 0x9ff   :  { %1706 = vtanh.f32 %v532_v23 }
 0xa07   :  { %v1705_v24 = vpop.eup %1704 }
 0xa08   :  { %537 = vrot.lane.b32.xlu0 %v1705_v24, %s1841_s21 }
 0xa09   :  { %v1707_v25 = vpop.eup %1706 }
 0xa0a   :  { %539 = vrot.lane.b32.xlu1 %v1707_v25, %s1841_s21 }
 0xa7a   :  { %v538_v26 = vpop.permute.xlu0 %537 }
 0xa7b   :  { %v543_v27 = vmul.f32 %v1701_v10, %v538_v26 }
 0xa7c   :  { %v540_v28 = vpop.permute.xlu1 %539 }
 0xa7d   :  { %547 = vrot.lane.b32.xlu0 %v543_v27, %s1842_s26  ;;  %v544_v29 = vmul.f32 %v1703_v13, %v540_v28 }
 0xa7f   :  { %549 = vrot.lane.b32.xlu1 %v544_v29, %s1842_s26 }
 0xa81   :  { %557 = vrot.lane.b32.xlu0 %v531_v20, %s1843_s27 }
 0xa83   :  { %559 = vrot.lane.b32.xlu1 %v532_v23, %s1843_s27 }
 0xaef   :  { %v548_v30 = vpop.permute.xlu0 %547 }
 0xaf0   :  { %553 = vst.msk [vmem:[#allocation2] sm:$0xff] %vm23_vm0, %v548_v30 }
 0xaf1   :  { %v550_v31 = vpop.permute.xlu1 %549 }
 0xaf2   :  { %554 = vst.msk [vmem:[#allocation2 + $0x8] sm:$0xff] %vm23_vm0, %v550_v31 }
 0xaf3   :  { %v558_v32 = vpop.permute.xlu0 %557 }
 0xaf4   :  { %563 = vst.msk [vmem:[#allocation4] sm:$0xff] %vm23_vm0, %v558_v32  ;;  %v1473_v32 = vld [vmem:[%s2201_s0 + $0x40] sm:$0xff] }
 0xaf5   :  { %v560_v33 = vpop.permute.xlu1 %559 }
 0xaf6   :  { %564 = vst.msk [vmem:[#allocation4 + $0x8] sm:$0xff] %vm23_vm0, %v560_v33 }
 0xaf7   :  { %v565_v34 = vld [vmem:[#allocation2] sm:$0xff] }
 0xaf9   :  { %v566_v35 = vld [vmem:[#allocation2 + $0x8] sm:$0xff] }
 0xafa   :  { %v569_v36 = vpack.c.bf16 %v566_v35, %v565_v34  ;;  %v1474_v34 = vld [vmem:[%s2201_s0 + $0x48] sm:$0xff] }
 0xafb   :  { %v567_v52 = vld [vmem:[#allocation4] sm:$0xff] }
 0xafc   :  { %1579 = vmatpush3.bf16.msra.mxu0 %v569_v36 }
 0xafd   :  { %1592 = vmatprep.subr.bf16.mxu0 %v1839_v0  ;;  %v568_v53 = vld [vmem:[#allocation4 + $0x8] sm:$0xff] }
 0xaff   :  { %1581 = vmatmul.mubr.msk.bf16.vlgmr.msra.gmra.mrb[12].mxu0 %vm44_vm2, %v1897_v5 }
 0xb00   :  { %1594 = vmatprep.mubr.msk.bf16.mxu0 %vm1840_vm1, %v1839_v0 }
 0xbd2   :  { %v604_v37 = vpop.f32.mrb[12].mxu0 }
 0xbd3   :  { %v1582_v38 = vpop.f32.mrb[13].mxu0 }
 0xbd4   :  { %v607_v39 = vpop.f32.mrb[14].mxu0 }
 0xbd5   :  { %v611_v40 = vpack.c.bf16 %v607_v39, %v604_v37  ;;  %v1583_v41 = vpop.f32.mrb[15].mxu0 }
 0xbd7   :  { %1589 = vmatmul.mubr.msk.bf16.vlgmr.msra.gmra.mrb[12].mxu1 %vm23_vm0, %v611_v40 }
 0xbd8   :  { %1599 = vmatpush3.bf16.msra.mxu1 %v1887_v1  ;;  %1602 = vmatprep.mubr.msk.bf16.mxu1 %vm1840_vm1, %v1839_v0 }
 0xbd9   :  { %1600 = vmatprep.subr.bf16.mxu1 %v1839_v0 }
 0xbdc   :  { %1601 = vmatpush3.bf16.msra.mxu1 %v1907_v6 }
 0xbdd   :  { %1612 = vmatprep.subr.bf16.mxu1 %v1839_v0 }
 0xcaa   :  { %v652_v43 = vpop.f32.mrb[12].mxu1 }
 0xcab   :  { %v653_v45 = vadd.f32 %v1467_v42, %v652_v43  ;;  %v1590_v46 = vpop.f32.mrb[13].mxu1 }
 0xcac   :  { %v655_v47 = vpop.f32.mrb[14].mxu1 }
 0xcad   :  { %1708 = vtanh.f32 %v653_v45  ;;  %v656_v48 = vadd.f32 %v1468_v44, %v655_v47  ;;  %v1591_v49 = vpop.f32.mrb[15].mxu1  ;;  %v1470_v54 = vmul.f32 -1.442695, %v653_v45 }
 0xcaf   :  { %1710 = vtanh.f32 %v656_v48  ;;  %v1471_v55 = vmul.f32 -1.442695, %v656_v48 }
 0xcb0   :  { %1712 = vpow2.f32 %v1470_v54 }
 0xcb1   :  { %1714 = vpow2.f32 %v1471_v55 }
 0xcb7   :  { %v1709_v50 = vpop.eup %1708 }
 0xcb8   :  { %685 = vrot.lane.b32.xlu0 %v1709_v50, %s1841_s21 }
 0xcb9   :  { %v1711_v51 = vpop.eup %1710 }
 0xcba   :  { %687 = vrot.lane.b32.xlu1 %v1711_v51, %s1841_s21  ;;  %v1713_v56 = vpop.eup %1712 }
 0xcbb   :  { %v1715_v57 = vpop.eup %1714  ;;  %v665_v58 = vadd.f32 1.0, %v1713_v56 }
 0xcbc   :  { %675 = vrot.lane.b32.xlu0 %v567_v52, %s1841_s21  ;;  %v666_v59 = vadd.f32 1.0, %v1715_v57 }
 0xcbd   :  { %1716 = vrcp.f32 %v665_v58 }
 0xcbe   :  { %677 = vrot.lane.b32.xlu1 %v568_v53, %s1841_s21  ;;  %1718 = vrcp.f32 %v666_v59 }
 0xcc7   :  { %v1717_v60 = vpop.eup %1716 }
 0xcc8   :  { %v1719_v63 = vpop.eup %1718 }
 0xd2a   :  { %v686_v61 = vpop.permute.xlu0 %685 }
 0xd2b   :  { %v691_v62 = vmul.f32 %v1717_v60, %v686_v61 }
 0xd2c   :  { %v688_v2 = vpop.permute.xlu1 %687 }
 0xd2d   :  { %695 = vrot.lane.b32.xlu0 %v691_v62, %s1841_s21  ;;  %v692_v3 = vmul.f32 %v1719_v63, %v688_v2 }
 0xd2e   :  { %v676_v4 = vpop.permute.xlu0 %675 }
 0xd2f   :  { %697 = vrot.lane.b32.xlu1 %v692_v3, %s1841_s21  ;;  %v681_v7 = vmul.f32 %v1717_v60, %v676_v4 }
 0xd30   :  { %v678_v8 = vpop.permute.xlu1 %677 }
 0xd31   :  { %v682_v11 = vmul.f32 %v1719_v63, %v678_v8 }
 0xd9f   :  { %v696_v9 = vpop.permute.xlu0 %695 }
 0xda0   :  { %v701_v10 = vadd.f32 %v696_v9, %v681_v7 }
 0xda1   :  { %v698_v12 = vpop.permute.xlu1 %697 }
 0xda2   :  { %1720 = vtanh.f32 %v701_v10  ;;  %v702_v13 = vadd.f32 %v698_v12, %v682_v11 }
 0xda4   :  { %1722 = vtanh.f32 %v702_v13 }
 0xdac   :  { %v1721_v14 = vpop.eup %1720 }
 0xdad   :  { %707 = vrot.lane.b32.xlu0 %v1721_v14, %s1841_s21 }
 0xdae   :  { %v1723_v15 = vpop.eup %1722 }
 0xdaf   :  { %709 = vrot.lane.b32.xlu1 %v1723_v15, %s1841_s21 }
 0xe1f   :  { %v708_v16 = vpop.permute.xlu0 %707 }
 0xe20   :  { %v713_v17 = vmul.f32 %v1717_v60, %v708_v16 }
 0xe21   :  { %v710_v18 = vpop.permute.xlu1 %709 }
 0xe22   :  { %717 = vrot.lane.b32.xlu0 %v713_v17, %s1842_s26  ;;  %v714_v19 = vmul.f32 %v1719_v63, %v710_v18 }
 0xe24   :  { %719 = vrot.lane.b32.xlu1 %v714_v19, %s1842_s26 }
 0xe26   :  { %727 = vrot.lane.b32.xlu0 %v701_v10, %s1843_s27 }
 0xe28   :  { %729 = vrot.lane.b32.xlu1 %v702_v13, %s1843_s27 }
 0xe94   :  { %v718_v20 = vpop.permute.xlu0 %717 }
 0xe95   :  { %723 = vst.msk [vmem:[#allocation2] sm:$0xff] %vm23_vm0, %v718_v20 }
 0xe96   :  { %v720_v21 = vpop.permute.xlu1 %719 }
 0xe97   :  { %724 = vst.msk [vmem:[#allocation2 + $0x8] sm:$0xff] %vm23_vm0, %v720_v21 }
 0xe98   :  { %v728_v22 = vpop.permute.xlu0 %727 }
 0xe99   :  { %733 = vst.msk [vmem:[#allocation4] sm:$0xff] %vm23_vm0, %v728_v22 }
 0xe9a   :  { %v730_v23 = vpop.permute.xlu1 %729 }
 0xe9b   :  { %734 = vst.msk [vmem:[#allocation4 + $0x8] sm:$0xff] %vm23_vm0, %v730_v23  ;;  %v1480_v23 = vld [vmem:[%s2201_s0 + $0x58] sm:$0xff] }
 0xe9c   :  { %v735_v24 = vld [vmem:[#allocation2] sm:$0xff] }
 0xe9e   :  { %v736_v25 = vld [vmem:[#allocation2 + $0x8] sm:$0xff] }
 0xe9f   :  { %v739_v26 = vpack.c.bf16 %v736_v25, %v735_v24 }
 0xea0   :  { %v737_v42 = vld [vmem:[#allocation4] sm:$0xff] }
 0xea1   :  { %1593 = vmatpush3.bf16.msra.mxu0 %v739_v26 }
 0xea2   :  { %1606 = vmatprep.subr.bf16.mxu0 %v1839_v0  ;;  %v738_v43 = vld [vmem:[#allocation4 + $0x8] sm:$0xff] }
 0xea4   :  { %1595 = vmatmul.mubr.msk.bf16.vlgmr.msra.gmra.mrb[16].mxu0 %vm44_vm2, %v1897_v5 }
 0xea5   :  { %1608 = vmatprep.mubr.msk.bf16.mxu0 %vm1840_vm1, %v1839_v0 }
 0xf77   :  { %v774_v27 = vpop.f32.mrb[16].mxu0 }
 0xf78   :  { %v1596_v28 = vpop.f32.mrb[17].mxu0 }
 0xf79   :  { %v777_v29 = vpop.f32.mrb[18].mxu0 }
 0xf7a   :  { %v781_v30 = vpack.c.bf16 %v777_v29, %v774_v27  ;;  %v1597_v31 = vpop.f32.mrb[19].mxu0 }
 0xf7c   :  { %1603 = vmatmul.mubr.msk.bf16.vlgmr.msra.gmra.mrb[16].mxu1 %vm23_vm0, %v781_v30 }
 0xf7d   :  { %1613 = vmatpush3.bf16.msra.mxu1 %v1887_v1  ;;  %1616 = vmatprep.mubr.msk.bf16.mxu1 %vm1840_vm1, %v1839_v0 }
 0xf7e   :  { %1614 = vmatprep.subr.bf16.mxu1 %v1839_v0 }
 0xf81   :  { %1615 = vmatpush3.bf16.msra.mxu1 %v1907_v6 }
 0xf82   :  { %1626 = vmatprep.subr.bf16.mxu1 %v1839_v0 }
0x104f   :  { %v822_v33 = vpop.f32.mrb[16].mxu1 }
0x1050   :  { %v823_v35 = vadd.f32 %v1473_v32, %v822_v33  ;;  %v1604_v36 = vpop.f32.mrb[17].mxu1 }
0x1051   :  { %v825_v37 = vpop.f32.mrb[18].mxu1 }
0x1052   :  { %1724 = vtanh.f32 %v823_v35  ;;  %v826_v38 = vadd.f32 %v1474_v34, %v825_v37  ;;  %v1605_v39 = vpop.f32.mrb[19].mxu1  ;;  %v1476_v44 = vmul.f32 -1.442695, %v823_v35 }
0x1054   :  { %1726 = vtanh.f32 %v826_v38  ;;  %v1477_v45 = vmul.f32 -1.442695, %v826_v38 }
0x1055   :  { %1728 = vpow2.f32 %v1476_v44 }
0x1056   :  { %1730 = vpow2.f32 %v1477_v45 }
0x105c   :  { %v1725_v40 = vpop.eup %1724 }
0x105d   :  { %855 = vrot.lane.b32.xlu0 %v1725_v40, %s1841_s21 }
0x105e   :  { %v1727_v41 = vpop.eup %1726 }
0x105f   :  { %857 = vrot.lane.b32.xlu1 %v1727_v41, %s1841_s21  ;;  %v1729_v46 = vpop.eup %1728 }
0x1060   :  { %v1731_v47 = vpop.eup %1730  ;;  %v835_v48 = vadd.f32 1.0, %v1729_v46 }
0x1061   :  { %845 = vrot.lane.b32.xlu0 %v737_v42, %s1841_s21  ;;  %v836_v49 = vadd.f32 1.0, %v1731_v47 }
0x1062   :  { %1732 = vrcp.f32 %v835_v48 }
0x1063   :  { %847 = vrot.lane.b32.xlu1 %v738_v43, %s1841_s21  ;;  %1734 = vrcp.f32 %v836_v49 }
0x106c   :  { %v1733_v50 = vpop.eup %1732 }
0x106d   :  { %v1735_v53 = vpop.eup %1734 }
0x10cf   :  { %v856_v51 = vpop.permute.xlu0 %855 }
0x10d0   :  { %v861_v52 = vmul.f32 %v1733_v50, %v856_v51 }
0x10d1   :  { %v858_v54 = vpop.permute.xlu1 %857 }
0x10d2   :  { %865 = vrot.lane.b32.xlu0 %v861_v52, %s1841_s21  ;;  %v862_v55 = vmul.f32 %v1735_v53, %v858_v54 }
0x10d3   :  { %v846_v56 = vpop.permute.xlu0 %845 }
0x10d4   :  { %867 = vrot.lane.b32.xlu1 %v862_v55, %s1841_s21  ;;  %v851_v57 = vmul.f32 %v1733_v50, %v846_v56 }
0x10d5   :  { %v848_v58 = vpop.permute.xlu1 %847 }
0x10d6   :  { %v852_v61 = vmul.f32 %v1735_v53, %v848_v58 }
0x1144   :  { %v866_v59 = vpop.permute.xlu0 %865 }
0x1145   :  { %v871_v60 = vadd.f32 %v866_v59, %v851_v57 }
0x1146   :  { %v868_v62 = vpop.permute.xlu1 %867 }
0x1147   :  { %1736 = vtanh.f32 %v871_v60  ;;  %v872_v63 = vadd.f32 %v868_v62, %v852_v61 }
0x1149   :  { %1738 = vtanh.f32 %v872_v63 }
0x1151   :  { %v1737_v2 = vpop.eup %1736 }
0x1152   :  { %877 = vrot.lane.b32.xlu0 %v1737_v2, %s1841_s21  ;;  %v2114_v2 = vld [vmem:[%s2202_s1] sm:$0xff]  }
0x1153   :  { %v1739_v3 = vpop.eup %1738 }
0x1154   :  { %879 = vrot.lane.b32.xlu1 %v1739_v3, %s1841_s21 }
0x11c4   :  { %v878_v4 = vpop.permute.xlu0 %877 }
0x11c5   :  { %v883_v7 = vmul.f32 %v1733_v50, %v878_v4 }
0x11c6   :  { %v880_v8 = vpop.permute.xlu1 %879 }
0x11c7   :  { %887 = vrot.lane.b32.xlu0 %v883_v7, %s1842_s26  ;;  %v884_v9 = vmul.f32 %v1735_v53, %v880_v8 }
0x11c9   :  { %889 = vrot.lane.b32.xlu1 %v884_v9, %s1842_s26 }
0x11cb   :  { %897 = vrot.lane.b32.xlu0 %v871_v60, %s1843_s27 }
0x11cd   :  { %899 = vrot.lane.b32.xlu1 %v872_v63, %s1843_s27 }
0x1239   :  { %v888_v10 = vpop.permute.xlu0 %887 }
0x123a   :  { %893 = vst.msk [vmem:[#allocation2] sm:$0xff] %vm23_vm0, %v888_v10  ;;  %v1789_v10 = vld [vmem:[%s2203_s2] sm:$0xff]  }
0x123b   :  { %v890_v11 = vpop.permute.xlu1 %889 }
0x123c   :  { %894 = vst.msk [vmem:[#allocation2 + $0x8] sm:$0xff] %vm23_vm0, %v890_v11  ;;  %v1790_v11 = vld [vmem:[%s2203_s2 + $0x8] sm:$0xff]  }
0x123d   :  { %v898_v12 = vpop.permute.xlu0 %897 }
0x123e   :  { %903 = vst.msk [vmem:[#allocation4] sm:$0xff] %vm23_vm0, %v898_v12  ;;  %v1485_v12 = vld [vmem:[%s2201_s0 + $0x60] sm:$0xff] }
0x123f   :  { %v900_v13 = vpop.permute.xlu1 %899 }
0x1240   :  { %904 = vst.msk [vmem:[#allocation4 + $0x8] sm:$0xff] %vm23_vm0, %v900_v13 }
0x1241   :  { %v905_v14 = vld [vmem:[#allocation2] sm:$0xff] }
0x1243   :  { %v906_v15 = vld [vmem:[#allocation2 + $0x8] sm:$0xff] }
0x1244   :  { %v909_v16 = vpack.c.bf16 %v906_v15, %v905_v14  ;;  %v1486_v14 = vld [vmem:[%s2201_s0 + $0x68] sm:$0xff] }
0x1245   :  { %v907_v29 = vld [vmem:[#allocation4] sm:$0xff] }
0x1246   :  { %1607 = vmatpush3.bf16.msra.mxu0 %v909_v16 }
0x1247   :  { %1620 = vmatprep.subr.bf16.mxu0 %v1839_v0  ;;  %v908_v30 = vld [vmem:[#allocation4 + $0x8] sm:$0xff] }
0x1249   :  { %1609 = vmatmul.mubr.msk.bf16.vlgmr.msra.gmra.mrb[20].mxu0 %vm44_vm2, %v1897_v5  ;;  %v1479_v5 = vld [vmem:[%s2201_s0 + $0x50] sm:$0xff] }
0x124a   :  { %1622 = vmatprep.mubr.msk.bf16.mxu0 %vm1840_vm1, %v1839_v0 }
0x131c   :  { %v944_v17 = vpop.f32.mrb[20].mxu0 }
0x131d   :  { %v1610_v18 = vpop.f32.mrb[21].mxu0 }
0x131e   :  { %v947_v19 = vpop.f32.mrb[22].mxu0 }
0x131f   :  { %v951_v20 = vpack.c.bf16 %v947_v19, %v944_v17  ;;  %v1611_v21 = vpop.f32.mrb[23].mxu0 }
0x1321   :  { %1617 = vmatmul.mubr.msk.bf16.vlgmr.msra.gmra.mrb[20].mxu1 %vm23_vm0, %v951_v20 }
0x1322   :  { %1627 = vmatpush3.bf16.msra.mxu1 %v1887_v1  ;;  %1630 = vmatprep.mubr.msk.bf16.mxu1 %vm1840_vm1, %v1839_v0 }
0x1323   :  { %1628 = vmatprep.subr.bf16.mxu1 %v1839_v0 }
0x1326   :  { %1629 = vmatpush3.bf16.msra.mxu1 %v1907_v6 }
0x1327   :  { %1640 = vmatprep.subr.bf16.mxu1 %v1839_v0 }
0x13f4   :  { %v992_v22 = vpop.f32.mrb[20].mxu1 }
0x13f5   :  { %v993_v24 = vadd.f32 %v1479_v5, %v992_v22  ;;  %v1618_v1 = vpop.f32.mrb[21].mxu1 }
0x13f6   :  { %v995_v25 = vpop.f32.mrb[22].mxu1 }
0x13f7   :  { %1740 = vtanh.f32 %v993_v24  ;;  %v996_v26 = vadd.f32 %v1480_v23, %v995_v25  ;;  %v1619_v27 = vpop.f32.mrb[23].mxu1  ;;  %v1482_v31 = vmul.f32 -1.442695, %v993_v24 }
0x13f9   :  { %1742 = vtanh.f32 %v996_v26  ;;  %v1483_v32 = vmul.f32 -1.442695, %v996_v26 }
0x13fa   :  { %1744 = vpow2.f32 %v1482_v31 }
0x13fb   :  { %1746 = vpow2.f32 %v1483_v32 }
0x1401   :  { %v1741_v28 = vpop.eup %1740 }
0x1402   :  { %1025 = vrot.lane.b32.xlu0 %v1741_v28, %s1841_s21 }
0x1403   :  { %v1743_v6 = vpop.eup %1742 }
0x1404   :  { %1027 = vrot.lane.b32.xlu1 %v1743_v6, %s1841_s21  ;;  %v1745_v33 = vpop.eup %1744 }
0x1405   :  { %v1747_v34 = vpop.eup %1746  ;;  %v1005_v35 = vadd.f32 1.0, %v1745_v33 }
0x1406   :  { %1015 = vrot.lane.b32.xlu0 %v907_v29, %s1841_s21  ;;  %v1006_v36 = vadd.f32 1.0, %v1747_v34 }
0x1407   :  { %1748 = vrcp.f32 %v1005_v35 }
0x1408   :  { %1017 = vrot.lane.b32.xlu1 %v908_v30, %s1841_s21  ;;  %1750 = vrcp.f32 %v1006_v36 }
0x1411   :  { %v1749_v37 = vpop.eup %1748 }
0x1412   :  { %v1751_v40 = vpop.eup %1750 }
0x1474   :  { %v1026_v38 = vpop.permute.xlu0 %1025 }
0x1475   :  { %v1031_v39 = vmul.f32 %v1749_v37, %v1026_v38 }
0x1476   :  { %v1028_v41 = vpop.permute.xlu1 %1027 }
0x1477   :  { %1035 = vrot.lane.b32.xlu0 %v1031_v39, %s1841_s21  ;;  %v1032_v42 = vmul.f32 %v1751_v40, %v1028_v41 }
0x1478   :  { %v1016_v43 = vpop.permute.xlu0 %1015 }
0x1479   :  { %1037 = vrot.lane.b32.xlu1 %v1032_v42, %s1841_s21  ;;  %v1021_v44 = vmul.f32 %v1749_v37, %v1016_v43 }
0x147a   :  { %v1018_v45 = vpop.permute.xlu1 %1017 }
0x147b   :  { %v1022_v48 = vmul.f32 %v1751_v40, %v1018_v45 }
0x14e9   :  { %v1036_v46 = vpop.permute.xlu0 %1035 }
0x14ea   :  { %v1041_v47 = vadd.f32 %v1036_v46, %v1021_v44 }
0x14eb   :  { %v1038_v49 = vpop.permute.xlu1 %1037 }
0x14ec   :  { %1752 = vtanh.f32 %v1041_v47  ;;  %v1042_v50 = vadd.f32 %v1038_v49, %v1022_v48 }
0x14ee   :  { %1754 = vtanh.f32 %v1042_v50 }
0x14f6   :  { %v1753_v51 = vpop.eup %1752 }
0x14f7   :  { %1047 = vrot.lane.b32.xlu0 %v1753_v51, %s1841_s21 }
0x14f8   :  { %v1755_v52 = vpop.eup %1754 }
0x14f9   :  { %1049 = vrot.lane.b32.xlu1 %v1755_v52, %s1841_s21 }
0x1569   :  { %v1048_v53 = vpop.permute.xlu0 %1047 }
0x156a   :  { %v1053_v54 = vmul.f32 %v1749_v37, %v1048_v53 }
0x156b   :  { %v1050_v55 = vpop.permute.xlu1 %1049 }
0x156c   :  { %1057 = vrot.lane.b32.xlu0 %v1053_v54, %s1842_s26  ;;  %v1054_v56 = vmul.f32 %v1751_v40, %v1050_v55 }
0x156e   :  { %1059 = vrot.lane.b32.xlu1 %v1054_v56, %s1842_s26 }
0x1570   :  { %1067 = vrot.lane.b32.xlu0 %v1041_v47, %s1843_s27 }
0x1572   :  { %1069 = vrot.lane.b32.xlu1 %v1042_v50, %s1843_s27 }
0x15de   :  { %v1058_v57 = vpop.permute.xlu0 %1057 }
0x15df   :  { %1063 = vst.msk [vmem:[#allocation2] sm:$0xff] %vm23_vm0, %v1058_v57 }
0x15e0   :  { %v1060_v58 = vpop.permute.xlu1 %1059 }
0x15e1   :  { %1064 = vst.msk [vmem:[#allocation2 + $0x8] sm:$0xff] %vm23_vm0, %v1060_v58  ;;  %v1491_v58 = vld [vmem:[%s2201_s0 + $0x70] sm:$0xff] }
0x15e2   :  { %v1068_v59 = vpop.permute.xlu0 %1067 }
0x15e3   :  { %1073 = vst.msk [vmem:[#allocation4] sm:$0xff] %vm23_vm0, %v1068_v59 }
0x15e4   :  { %v1070_v60 = vpop.permute.xlu1 %1069 }
0x15e5   :  { %1074 = vst.msk [vmem:[#allocation4 + $0x8] sm:$0xff] %vm23_vm0, %v1070_v60  ;;  %v1492_v60 = vld [vmem:[%s2201_s0 + $0x78] sm:$0xff]  ;;  %s1844_s0 = smov [#allocation2]  }
0x15e6   :  { %v1075_v61 = vld [vmem:[#allocation2] sm:$0xff]  ;;  %s1420_s11 = sshll.u32 %s1844_s0, 4  ;;  %s1421_s11 = int_to_ptr.vmem [resolvable:$true] %s1420_s11 }
0x15e7   :  { %s1791_s13 = scalar_lea.vmem %s1421_s11, 256  ;;  %p1796_p1 = scmp.lt.s32.totalorder %s1421_s11, %s1421_s11 }
0x15e8   :  { %v1076_v62 = vld [vmem:[#allocation2 + $0x8] sm:$0xff]  ;;  %p1792_p0 = scmp.ne.s32.totalorder %s1421_s11, %s1791_s13  ;;  %p1797_p2 = scmp.lt.s32.totalorder %s1791_s13, %s1791_s13 }
0x15e9   :  { %v1079_v63 = vpack.c.bf16 %v1076_v62, %v1075_v61 }
0x15ea   :  { %v1077_v21 = vld [vmem:[#allocation4] sm:$0xff]  ;;  %p1798_p3 = por %p1797_p2, %p1796_p1 }
0x15eb   :  { %1621 = vmatpush3.bf16.msra.mxu0 %v1079_v63 }
0x15ec   :  { %1634 = vmatprep.subr.bf16.mxu0 %v1839_v0  ;;  %v1078_v5 = vld [vmem:[#allocation4 + $0x8] sm:$0xff]  ;;  %p1799_p4 = pnand %p1798_p3, %p1792_p0 }
0x15ee   :  { %1623 = vmatmul.mubr.msk.bf16.vlgmr.msra.gmra.mrb[24].mxu0 %vm44_vm2, %v2114_v2 }
0x15ef   :  { %1636 = vmatprep.mubr.msk.bf16.mxu0 %vm1840_vm1, %v1839_v0 }
0x16c1   :  { %v1114_v3 = vpop.f32.mrb[24].mxu0 }
0x16c2   :  { %v1624_v4 = vpop.f32.mrb[25].mxu0 }
0x16c3   :  { %v1117_v7 = vpop.f32.mrb[26].mxu0 }
0x16c4   :  { %v1121_v8 = vpack.c.bf16 %v1117_v7, %v1114_v3  ;;  %v1625_v9 = vpop.f32.mrb[27].mxu0 }
0x16c6   :  { %1631 = vmatmul.mubr.msk.bf16.vlgmr.msra.gmra.mrb[24].mxu1 %vm23_vm0, %v1121_v8 }
0x16c7   :  { %1641 = vmatpush3.bf16.msra.mxu1 %v1789_v10  ;;  %1644 = vmatprep.mubr.msk.bf16.mxu1 %vm1840_vm1, %v1839_v0 }
0x16c8   :  { %1642 = vmatprep.subr.bf16.mxu1 %v1839_v0 }
0x16cb   :  { %1643 = vmatpush3.bf16.msra.mxu1 %v1790_v11 }
0x1799   :  { %v1162_v13 = vpop.f32.mrb[24].mxu1 }
0x179a   :  { %v1163_v15 = vadd.f32 %v1485_v12, %v1162_v13  ;;  %v1632_v16 = vpop.f32.mrb[25].mxu1 }
0x179b   :  { %v1165_v17 = vpop.f32.mrb[26].mxu1 }
0x179c   :  { %1756 = vtanh.f32 %v1163_v15  ;;  %v1166_v18 = vadd.f32 %v1486_v14, %v1165_v17  ;;  %v1633_v0 = vpop.f32.mrb[27].mxu1  ;;  %v1488_v22 = vmul.f32 -1.442695, %v1163_v15 }
0x179e   :  { %1758 = vtanh.f32 %v1166_v18  ;;  %v1489_v23 = vmul.f32 -1.442695, %v1166_v18 }
0x179f   :  { %1760 = vpow2.f32 %v1488_v22 }
0x17a0   :  { %1762 = vpow2.f32 %v1489_v23 }
0x17a6   :  { %v1757_v19 = vpop.eup %1756 }
0x17a7   :  { %1195 = vrot.lane.b32.xlu0 %v1757_v19, %s1841_s21 }
0x17a8   :  { %v1759_v20 = vpop.eup %1758 }
0x17a9   :  { %1197 = vrot.lane.b32.xlu1 %v1759_v20, %s1841_s21  ;;  %v1761_v24 = vpop.eup %1760 }
0x17aa   :  { %v1763_v1 = vpop.eup %1762  ;;  %v1175_v25 = vadd.f32 1.0, %v1761_v24 }
0x17ab   :  { %1185 = vrot.lane.b32.xlu0 %v1077_v21, %s1841_s21  ;;  %v1176_v26 = vadd.f32 1.0, %v1763_v1 }
0x17ac   :  { %1764 = vrcp.f32 %v1175_v25 }
0x17ad   :  { %1187 = vrot.lane.b32.xlu1 %v1078_v5, %s1841_s21  ;;  %1766 = vrcp.f32 %v1176_v26 }
0x17b6   :  { %v1765_v27 = vpop.eup %1764 }
0x17b7   :  { %v1767_v29 = vpop.eup %1766 }
0x1819   :  { %v1196_v28 = vpop.permute.xlu0 %1195 }
0x181a   :  { %v1201_v6 = vmul.f32 %v1765_v27, %v1196_v28 }
0x181b   :  { %v1198_v30 = vpop.permute.xlu1 %1197 }
0x181c   :  { %1205 = vrot.lane.b32.xlu0 %v1201_v6, %s1841_s21  ;;  %v1202_v31 = vmul.f32 %v1767_v29, %v1198_v30 }
0x181d   :  { %v1186_v32 = vpop.permute.xlu0 %1185 }
0x181e   :  { %1207 = vrot.lane.b32.xlu1 %v1202_v31, %s1841_s21  ;;  %v1191_v33 = vmul.f32 %v1765_v27, %v1186_v32 }
0x181f   :  { %v1188_v34 = vpop.permute.xlu1 %1187 }
0x1820   :  { %v1192_v37 = vmul.f32 %v1767_v29, %v1188_v34 }
0x188e   :  { %v1206_v35 = vpop.permute.xlu0 %1205 }
0x188f   :  { %v1211_v36 = vadd.f32 %v1206_v35, %v1191_v33 }
0x1890   :  { %v1208_v38 = vpop.permute.xlu1 %1207 }
0x1891   :  { %1768 = vtanh.f32 %v1211_v36  ;;  %v1212_v39 = vadd.f32 %v1208_v38, %v1192_v37 }
0x1893   :  { %1770 = vtanh.f32 %v1212_v39 }
0x189b   :  { %v1769_v40 = vpop.eup %1768 }
0x189c   :  { %1217 = vrot.lane.b32.xlu0 %v1769_v40, %s1841_s21 }
0x189d   :  { %v1771_v41 = vpop.eup %1770 }
0x189e   :  { %1219 = vrot.lane.b32.xlu1 %v1771_v41, %s1841_s21 }
0x190e   :  { %v1218_v42 = vpop.permute.xlu0 %1217 }
0x190f   :  { %v1223_v43 = vmul.f32 %v1765_v27, %v1218_v42 }
0x1910   :  { %v1220_v44 = vpop.permute.xlu1 %1219 }
0x1911   :  { %1227 = vrot.lane.b32.xlu0 %v1223_v43, %s1842_s26  ;;  %v1224_v45 = vmul.f32 %v1767_v29, %v1220_v44 }
0x1913   :  { %1229 = vrot.lane.b32.xlu1 %v1224_v45, %s1842_s26 }
0x1915   :  { %1237 = vrot.lane.b32.xlu0 %v1211_v36, %s1843_s27 }
0x1917   :  { %1239 = vrot.lane.b32.xlu1 %v1212_v39, %s1843_s27 }
0x1983   :  { %v1228_v46 = vpop.permute.xlu0 %1227 }
0x1984   :  { %1233 = vst.msk [vmem:[#allocation2] sm:$0xff] %vm23_vm0, %v1228_v46 }
0x1985   :  { %v1230_v47 = vpop.permute.xlu1 %1229 }
0x1986   :  { %1234 = vst.msk [vmem:[#allocation2 + $0x8] sm:$0xff] %vm23_vm0, %v1230_v47 }
0x1987   :  { %v1238_v48 = vpop.permute.xlu0 %1237 }
0x1988   :  { %1243 = vst.msk [vmem:[#allocation4] sm:$0xff] %vm23_vm0, %v1238_v48 }
0x1989   :  { %v1240_v49 = vpop.permute.xlu1 %1239 }
0x198a   :  { %1244 = vst.msk [vmem:[#allocation4 + $0x8] sm:$0xff] %vm23_vm0, %v1240_v49 }
0x198b   :  { %v1245_v50 = vld [vmem:[#allocation2] sm:$0xff] }
0x198d   :  { %v1246_v51 = vld [vmem:[#allocation2 + $0x8] sm:$0xff] }
0x198e   :  { %v1249_v52 = vpack.c.bf16 %v1246_v51, %v1245_v50 }
0x198f   :  { %v1247_v8 = vld [vmem:[#allocation4] sm:$0xff] }
0x1990   :  { %1635 = vmatpush3.bf16.msra.mxu0 %v1249_v52 }
0x1991   :  { %v1248_v9 = vld [vmem:[#allocation4 + $0x8] sm:$0xff] }
0x1993   :  { %1637 = vmatmul.mubr.msk.bf16.vlgmr.msra.gmra.mrb[28].mxu0 %vm44_vm2, %v2114_v2 }
0x1a66   :  { %v1284_v53 = vpop.f32.mrb[28].mxu0 }
0x1a67   :  { %v1638_v54 = vpop.f32.mrb[29].mxu0 }
0x1a68   :  { %v1287_v55 = vpop.f32.mrb[30].mxu0 }
0x1a69   :  { %v1291_v56 = vpack.c.bf16 %v1287_v55, %v1284_v53  ;;  %v1639_v57 = vpop.f32.mrb[31].mxu0 }
0x1a6b   :  { %1645 = vmatmul.mubr.msk.bf16.vlgmr.msra.gmra.mrb[28].mxu1 %vm23_vm0, %v1291_v56 }
0x1b3e   :  { %v1332_v59 = vpop.f32.mrb[28].mxu1 }
0x1b3f   :  { %v1333_v61 = vadd.f32 %v1491_v58, %v1332_v59  ;;  %v1646_v62 = vpop.f32.mrb[29].mxu1 }
0x1b40   :  { %v1335_v63 = vpop.f32.mrb[30].mxu1 }
0x1b41   :  { %1772 = vtanh.f32 %v1333_v61  ;;  %v1336_v2 = vadd.f32 %v1492_v60, %v1335_v63  ;;  %v1647_v3 = vpop.f32.mrb[31].mxu1  ;;  %v1494_v10 = vmul.f32 -1.442695, %v1333_v61 }
0x1b43   :  { %1774 = vtanh.f32 %v1336_v2  ;;  %v1495_v11 = vmul.f32 -1.442695, %v1336_v2 }
0x1b44   :  { %1776 = vpow2.f32 %v1494_v10 }
0x1b45   :  { %1778 = vpow2.f32 %v1495_v11 }
0x1b4b   :  { %v1773_v4 = vpop.eup %1772 }
0x1b4c   :  { %1365 = vrot.lane.b32.xlu0 %v1773_v4, %s1841_s21 }
0x1b4d   :  { %v1775_v7 = vpop.eup %1774 }
0x1b4e   :  { %1367 = vrot.lane.b32.xlu1 %v1775_v7, %s1841_s21  ;;  %v1777_v12 = vpop.eup %1776 }
0x1b4f   :  { %v1779_v13 = vpop.eup %1778  ;;  %v1345_v14 = vadd.f32 1.0, %v1777_v12 }
0x1b50   :  { %1355 = vrot.lane.b32.xlu0 %v1247_v8, %s1841_s21  ;;  %v1346_v15 = vadd.f32 1.0, %v1779_v13 }
0x1b51   :  { %1780 = vrcp.f32 %v1345_v14 }
0x1b52   :  { %1357 = vrot.lane.b32.xlu1 %v1248_v9, %s1841_s21  ;;  %1782 = vrcp.f32 %v1346_v15 }
0x1b5b   :  { %v1781_v16 = vpop.eup %1780 }
0x1b5c   :  { %v1783_v0 = vpop.eup %1782 }
0x1bbe   :  { %v1366_v17 = vpop.permute.xlu0 %1365 }
0x1bbf   :  { %v1371_v18 = vmul.f32 %v1781_v16, %v1366_v17 }
0x1bc0   :  { %v1368_v19 = vpop.permute.xlu1 %1367 }
0x1bc1   :  { %1375 = vrot.lane.b32.xlu0 %v1371_v18, %s1841_s21  ;;  %v1372_v20 = vmul.f32 %v1783_v0, %v1368_v19 }
0x1bc2   :  { %v1356_v21 = vpop.permute.xlu0 %1355 }
0x1bc3   :  { %1377 = vrot.lane.b32.xlu1 %v1372_v20, %s1841_s21  ;;  %v1361_v5 = vmul.f32 %v1781_v16, %v1356_v21 }
0x1bc4   :  { %v1358_v22 = vpop.permute.xlu1 %1357 }
0x1bc5   :  { %v1362_v1 = vmul.f32 %v1783_v0, %v1358_v22 }
0x1c33   :  { %v1376_v23 = vpop.permute.xlu0 %1375 }
0x1c34   :  { %v1381_v24 = vadd.f32 %v1376_v23, %v1361_v5 }
0x1c35   :  { %v1378_v25 = vpop.permute.xlu1 %1377 }
0x1c36   :  { %1784 = vtanh.f32 %v1381_v24  ;;  %v1382_v26 = vadd.f32 %v1378_v25, %v1362_v1 }
0x1c38   :  { %1786 = vtanh.f32 %v1382_v26 }
0x1c40   :  { %v1785_v27 = vpop.eup %1784 }
0x1c41   :  { %1387 = vrot.lane.b32.xlu0 %v1785_v27, %s1841_s21 }
0x1c42   :  { %v1787_v28 = vpop.eup %1786 }
0x1c43   :  { %1389 = vrot.lane.b32.xlu1 %v1787_v28, %s1841_s21  ;;  %s1845_s21 = smov [#allocation4]  }
0x1c44   :  { %s1432_s12 = sshll.u32 %s1845_s21, 4  ;;  %s1433_s12 = int_to_ptr.vmem [resolvable:$true] %s1432_s12 }
0x1cb3   :  { %v1388_v6 = vpop.permute.xlu0 %1387 }
0x1cb4   :  { %v1393_v29 = vmul.f32 %v1781_v16, %v1388_v6 }
0x1cb5   :  { %v1390_v30 = vpop.permute.xlu1 %1389 }
0x1cb6   :  { %1397 = vrot.lane.b32.xlu0 %v1393_v29, %s1842_s26  ;;  %v1394_v31 = vmul.f32 %v1783_v0, %v1390_v30 }
0x1cb8   :  { %1399 = vrot.lane.b32.xlu1 %v1394_v31, %s1842_s26 }
0x1cba   :  { %1407 = vrot.lane.b32.xlu0 %v1381_v24, %s1843_s27 }
0x1cbc   :  { %1409 = vrot.lane.b32.xlu1 %v1382_v26, %s1843_s27 }
0x1d28   :  { %v1398_v32 = vpop.permute.xlu0 %1397 }
0x1d29   :  { %1403 = vst.msk [vmem:[#allocation2] sm:$0xff] %vm23_vm0, %v1398_v32 }
0x1d2a   :  { %v1400_v33 = vpop.permute.xlu1 %1399 }
0x1d2b   :  { %1404 = vst.msk [vmem:[#allocation2 + $0x8] sm:$0xff] %vm23_vm0, %v1400_v33 }
0x1d2c   :  { %v1408_v34 = vpop.permute.xlu0 %1407 }
0x1d2d   :  { %1413 = vst.msk [vmem:[#allocation4] sm:$0xff] %vm23_vm0, %v1408_v34 }
0x1d2e   :  { %1802 = shalt.err (!%p1799_p4)
}
0x1d2f   :  { %s1803_s14 = scalar_lea.hbm %s2204_s3, 256 }
0x1d30   :  { %p1804_p5 = scmp.ne.s32.totalorder %s2204_s3, %s1803_s14  ;;  %p1807_p6 = scmp.lt.u32.totalorder %s1803_s14, %s2204_s3 }
0x1d32   :  { %p1809_p7 = pnand %p1807_p6, %p1804_p5 }
0x1d34   :  { %1812 = shalt.err (!%p1809_p7)
}
0x1d35   :  { %s1846_s19 = smov 128   ;;  %s1847_s20 = smov 8   ;;  %v1410_v35 = vpop.permute.xlu1 %1409 }
0x1d36   :  { %1426 = dma.vmem_to_hbm [thread:$0]  %s1421_s11, 256, %s2204_s3, [#allocation3], %s1846_s19, %s1846_s19, %s1847_s20   ;;  %1414 = vst.msk [vmem:[#allocation4 + $0x8] sm:$0xff] %vm23_vm0, %v1410_v35 }
0x1d37   :  { %s1813_s24 = scalar_lea.vmem %s1433_s12, 256  ;;  %p1818_p9 = scmp.lt.s32.totalorder %s1433_s12, %s1433_s12 }
0x1d38   :  { %p1814_p8 = scmp.ne.s32.totalorder %s1433_s12, %s1813_s24  ;;  %p1819_p10 = scmp.lt.s32.totalorder %s1813_s24, %s1813_s24 }
0x1d3a   :  { %p1820_p11 = por %p1819_p10, %p1818_p9 }
0x1d3c   :  { %p1821_p12 = pnand %p1820_p11, %p1814_p8 }
0x1d3e   :  { %1824 = shalt.err (!%p1821_p12)
}
0x1d3f   :  { %s1825_s1 = scalar_lea.hbm %s2205_s4, 256 }
0x1d40   :  { %p1826_p13 = scmp.ne.s32.totalorder %s2205_s4, %s1825_s1  ;;  %p1829_p0 = scmp.lt.u32.totalorder %s1825_s1, %s2205_s4 }
0x1d42   :  { %p1831_p1 = pnand %p1829_p0, %p1826_p13 }
0x1d44   :  { %1834 = shalt.err (!%p1831_p1)
}
0x1d45   :  { %1438 = dma.vmem_to_hbm [thread:$0]  %s1433_s12, 256, %s2205_s4, [#allocation5], %s1846_s19, %s1846_s19, %s1847_s20  }
0x1d46   :  { %1835 = dma.done.wait [#allocation3], 256  }
0x1d47   :  { %1836 = vsyncadd [#allocation3], 4294967040 }
0x1d48   :  { %1837 = dma.done.wait [#allocation5], 256  }
0x1d49   :  { %1838 = vsyncadd [#allocation5], 4294967040 }
0x1d4a   :  { %1445 = vsyncpa [#allocation3], 1 }
0x1d4b   :  { %1446 = vsyncpa [#allocation5], 1 }

</bundles_post_ra>
